<compile_context>
chip_gen: v7x
topology: tpu7x:2x2x1
jax: 0.10.0
libtpu: 0.0.40
codegen_flags: <defaults>
</compile_context>

<pallas_src>
import functools

import jax
import jax.numpy as jnp
import numpy as np
from jax.experimental import pallas as pl
from jax.experimental.pallas import tpu as pltpu


def _round_up(x, m):
    return (x + m - 1) // m * m


def _pick_tile_rows(H, W, target_m=256):
    # Smallest divisor of H whose tile gives M = TH*W >= target_m (fills a
    # 256-wide MXU pass on v6e/v7x and minimizes grid steps).  Falls back to H.
    for th in range(1, H + 1):
        if H % th == 0 and th * W >= target_m:
            return th
    return H


def _hetconv_kernel(xp_ref, w_ref, b_ref, o_ref, mat_ref, *, TH, W, Cin):
    # xp_ref : (1, H+2, Wp, Cin) zero-padded NHWC image (bf16), Wp a multiple
    #          of 16 so in-kernel reshapes are sublane-tile aligned.  The block
    #          index ignores the row-tile axis -> resident across row tiles.
    # w_ref  : (9*Cin, Cout_pad)  folded weights (bf16), rows = (ky, kx, cin).
    # b_ref  : (1, Cout_pad)      folded bias (f32).
    # o_ref  : (1, TH*W, Cout_pad) output row-tile (bf16), lane-dense.
    # mat_ref: (TH*W, 9*Cin)      VMEM scratch holding the im2col matrix.
    t = pl.program_id(1)
    row0 = pl.multiple_of(t * TH, TH)

    # Rows needed by this tile; dynamic offset on the major (H) axis only.
    tile = xp_ref[0, pl.ds(row0, TH + 2), :, :]          # (TH+2, Wp, Cin)

    for kx in range(3):
        # One width-shifted view per kx (3 instead of 9 relayouts).  After
        # this slice the data is compact with width W (a multiple of the bf16
        # sublane tile when W % 16 == 0), so the ky slices and reshapes below
        # are layout-preserving.
        colsx = tile[:, kx:kx + W, :]                    # (TH+2, W, Cin)
        for ky in range(3):
            tap = ky * 3 + kx
            patch = colsx[ky:ky + TH]                    # (TH, W, Cin), major slice
            mat_ref[:, tap * Cin:(tap + 1) * Cin] = patch.reshape(TH * W, Cin)

    # Single MXU contraction with f32 accumulation; bias added once on the
    # f32 accumulator, then cast to the (bf16) output dtype.
    acc = jnp.dot(mat_ref[...], w_ref[...], preferred_element_type=jnp.float32)
    o_ref[0] = (acc + b_ref[...]).astype(o_ref.dtype)


def _expand_grouped(w, p):
    # w: (Cout, Cin//p, kh, kw) -> dense block-diagonal (Cout, Cin, kh, kw)
    Cout, cin_g, kh, kw = w.shape
    out_g = Cout // p
    dense = jnp.zeros((Cout, cin_g * p, kh, kw), w.dtype)
    for g in range(p):
        dense = dense.at[g * out_g:(g + 1) * out_g,
                         g * cin_g:(g + 1) * cin_g].set(w[g * out_g:(g + 1) * out_g])
    return dense


def fold_hetconv_params(params, p, lane_pad=128):
    """One-time parameter glue: fold the 3 convs into one padded (9*Cin, Cout_pad)
    bf16 weight matrix + f32 bias row.  Call once; reuse across forward calls."""
    w3, b3, w1, b1, w1g, b1g = (params[k] for k in
                                ('w3', 'b3', 'w1', 'b1', 'w1g', 'b1g'))
    Cout = w3.shape[0]
    Cin = w1.shape[1]
    if Cin % p != 0 or Cout % p != 0:
        raise ValueError('in/out channels must be divisible by p')

    wd = _expand_grouped(w3, p)                                   # (Cout,Cin,3,3)
    w_pt = w1[:, :, 0, 0] - _expand_grouped(w1g, p)[:, :, 0, 0]   # (Cout,Cin)
    wd = wd.at[:, :, 1, 1].add(w_pt)
    bd = (b3 + b1 - b1g).astype(jnp.float32)                      # (Cout,)

    # (Cout,Cin,3,3) -> (3,3,Cin,Cout) -> (9*Cin, Cout); row order = (ky,kx,ci)
    w_mat = jnp.transpose(wd, (2, 3, 1, 0)).reshape(9 * Cin, Cout)

    cout_pad = _round_up(Cout, lane_pad)                          # lane-dense N
    w_mat = jnp.pad(w_mat, ((0, 0), (0, cout_pad - Cout))).astype(jnp.bfloat16)
    b2d = jnp.pad(bd, (0, cout_pad - Cout)).reshape(1, cout_pad)
    return w_mat, b2d


@functools.partial(jax.jit, static_argnames=("cout",))
def efficient_hetconv2d(x_nchw, w_mat, b2d, *, cout):
    """Forward pass.  x_nchw: (N, Cin, H, W) f32; returns (N, Cout, H, W) bf16."""
    N, Cin, H, W = x_nchw.shape
    cout_pad = w_mat.shape[1]
    assert w_mat.shape[0] == 9 * Cin

    # Pad the width axis to a bf16 sublane-tile multiple (>= W+2) so in-kernel
    # width slices / reshapes stay tile-aligned.
    Wp = _round_up(W + 2, 16)

    # NCHW f32 -> padded NHWC bf16 (XLA fuses transpose + pad + cast under jit).
    x_nhwc = jnp.transpose(x_nchw, (0, 2, 3, 1)).astype(jnp.bfloat16)
    x_pad = jnp.pad(x_nhwc, ((0, 0), (1, 1), (1, Wp - 1 - W), (0, 0)))

    TH = _pick_tile_rows(H, W)          # TH*W >= 256 when possible
    n_tiles = H // TH                   # grid = (N, n_tiles), both "parallel"

    kernel = functools.partial(_hetconv_kernel, TH=TH, W=W, Cin=Cin)
    out_flat = pl.pallas_call(
        kernel,
        out_shape=jax.ShapeDtypeStruct((N, H * W, cout_pad), jnp.bfloat16),
        grid=(N, n_tiles),
        in_specs=[
            # Full padded image per batch element; index map ignores the row-
            # tile axis -> resident in VMEM across row tiles.
            pl.BlockSpec((1, H + 2, Wp, Cin), lambda n, t: (n, 0, 0, 0)),
            # Folded weights / bias are grid-invariant (resident).
            pl.BlockSpec((9 * Cin, cout_pad), lambda n, t: (0, 0)),
            pl.BlockSpec((1, cout_pad), lambda n, t: (0, 0)),
        ],
        out_specs=pl.BlockSpec((1, TH * W, cout_pad), lambda n, t: (n, t, 0)),
        scratch_shapes=[pltpu.VMEM((TH * W, 9 * Cin), jnp.bfloat16)],
        compiler_params=pltpu.CompilerParams(
            dimension_semantics=("parallel", "parallel"),
            vmem_limit_bytes=32 * 1024 * 1024),
    )(x_pad, w_mat, b2d)

    # Slice off the lane padding and relayout to NCHW in bf16 (half the bytes
    # of an f32 relayout).  Keep NHWC if the consumer allows it.
    out_nhwc = out_flat[:, :, :cout].reshape(N, H, W, cout)
    return jnp.transpose(out_nhwc, (0, 3, 1, 2))                  # (N,Cout,H,W) bf16


def _reference_forward(x, params, p):
    # Pure-JAX f32 reference with the original three convolutions (NCHW/OIHW).
    def conv(x, w, b, pad, groups):
        y = jax.lax.conv_general_dilated(
            x, w, window_strides=(1, 1),
            padding=[(pad, pad), (pad, pad)],
            feature_group_count=groups,
            dimension_numbers=('NCHW', 'OIHW', 'NCHW'))
        return y + b[None, :, None, None]

    return (conv(x, params['w3'], params['b3'], 1, p)
            + conv(x, params['w1'], params['b1'], 0, 1)
            - conv(x, params['w1g'], params['b1g'], 0, p))


def _init_params(key, in_feats, out_feats, p, ks=3):
    # Deterministic PyTorch-style uniform init (bound = 1/sqrt(fan_in)).
    ks3_fan = (in_feats // p) * ks * ks
    ks1g_fan = (in_feats // p)
    ks1_fan = in_feats
    keys = jax.random.split(key, 6)

    def u(k, shape, fan):
        bound = 1.0 / np.sqrt(fan)
        return jax.random.uniform(k, shape, jnp.float32, -bound, bound)

    return {
        'w3':  u(keys[0], (out_feats, in_feats // p, ks, ks), ks3_fan),
        'b3':  u(keys[1], (out_feats,), ks3_fan),
        'w1':  u(keys[2], (out_feats, in_feats, 1, 1), ks1_fan),
        'b1':  u(keys[3], (out_feats,), ks1_fan),
        'w1g': u(keys[4], (out_feats, in_feats // p, 1, 1), ks1g_fan),
        'b1g': u(keys[5], (out_feats,), ks1g_fan),
    }


if __name__ == "__main__":
    in_feats, out_feats, p = 8, 8, 4
    N, H, W = 2, 16, 16

    key = jax.random.PRNGKey(0)
    kx_key, kp_key = jax.random.split(key)
    x = jax.random.normal(kx_key, (N, in_feats, H, W), jnp.float32)
    params = _init_params(kp_key, in_feats, out_feats, p)

    # One-time parameter folding (hoisted out of the per-call forward).
    w_mat, b2d = jax.block_until_ready(fold_hetconv_params(params, p))

    out = efficient_hetconv2d(x, w_mat, b2d, cout=out_feats)
    out = jax.block_until_ready(out)

    ref = jax.block_until_ready(_reference_forward(x, params, p))
    # Kernel runs in bf16 (inputs/weights/output) with f32 accumulation; the
    # reference is full f32, so the tolerance reflects bf16 rounding, not
    # kernel error (a fold/indexing bug would produce O(1) discrepancies).
    out_f32 = np.asarray(jnp.asarray(out, jnp.float32))
    np.testing.assert_allclose(out_f32, np.asarray(ref), rtol=5e-2, atol=1e-1)
    print("KERNEL_OK")
</pallas_src>

<mosaic_0001>
module attributes {stable_mosaic.version = 11 : i64} {
  func.func @_hetconv_kernel(%arg0: i32, %arg1: i32, %arg2: memref<1x18x32x8xbf16, #tpu.memory_space<vmem>>, %arg3: memref<72x128xbf16, #tpu.memory_space<vmem>>, %arg4: memref<1x128xf32, #tpu.memory_space<vmem>>, %arg5: memref<1x256x128xbf16, #tpu.memory_space<vmem>>, %arg6: memref<256x72xbf16, #tpu.memory_space<vmem>>) attributes {dimension_semantics = [#tpu.dimension_semantics<parallel>, #tpu.dimension_semantics<parallel>], iteration_bounds = array<i64: 2, 1>, scalar_prefetch = 0 : i64, scratch_operands = 1 : i64, tpu.core_type = #tpu.core_type<tc>, window_params = [{transform_indices = @transform_0, window_bounds = array<i64: 1, 18, 32, 8>}, {pipeline_mode = #tpu.pipeline_mode<synchronous>, transform_indices = @transform_1, window_bounds = array<i64: 72, 128>}, {pipeline_mode = #tpu.pipeline_mode<synchronous>, transform_indices = @transform_2, window_bounds = array<i64: 1, 128>}, {transform_indices = @transform_3, window_bounds = array<i64: 1, 256, 128>}]} {
    %c16_i32 = arith.constant 16 : i32
    %0 = arith.muli %arg1, %c16_i32 : i32
    %1 = tpu.assume_multiple %0, 16 : i32
    %c0 = arith.constant 0 : index
    %2 = arith.index_cast %1 : i32 to index
    %c0_0 = arith.constant 0 : index
    %c0_1 = arith.constant 0 : index
    %3 = vector.load %arg2[%c0, %2, %c0_0, %c0_1] : memref<1x18x32x8xbf16, #tpu.memory_space<vmem>>, vector<1x18x32x8xbf16>
    %4 = vector.shape_cast %3 : vector<1x18x32x8xbf16> to vector<18x32x8xbf16>
    %5 = vector.extract_strided_slice %4 {offsets = [0, 0, 0], sizes = [18, 16, 8], strides = [1, 1, 1]} : vector<18x32x8xbf16> to vector<18x16x8xbf16>
    %6 = vector.extract_strided_slice %5 {offsets = [0, 0, 0], sizes = [16, 16, 8], strides = [1, 1, 1]} : vector<18x16x8xbf16> to vector<16x16x8xbf16>
    %7 = vector.shape_cast %6 : vector<16x16x8xbf16> to vector<256x8xbf16>
    %c0_2 = arith.constant 0 : index
    %c0_3 = arith.constant 0 : index
    %8 = vector.load %arg6[%c0_2, %c0_3] : memref<256x72xbf16, #tpu.memory_space<vmem>>, vector<256x8xbf16>
    tpu.vector_store %arg6[%c0_2, %c0_3], %7 {strides = array<i32>} : memref<256x72xbf16, #tpu.memory_space<vmem>>, vector<256x8xbf16>,
    %9 = vector.extract_strided_slice %5 {offsets = [1, 0, 0], sizes = [16, 16, 8], strides = [1, 1, 1]} : vector<18x16x8xbf16> to vector<16x16x8xbf16>
    %10 = vector.shape_cast %9 : vector<16x16x8xbf16> to vector<256x8xbf16>
    %c0_4 = arith.constant 0 : index
    %c24 = arith.constant 24 : index
    %11 = vector.load %arg6[%c0_4, %c24] : memref<256x72xbf16, #tpu.memory_space<vmem>>, vector<256x8xbf16>
    tpu.vector_store %arg6[%c0_4, %c24], %10 {strides = array<i32>} : memref<256x72xbf16, #tpu.memory_space<vmem>>, vector<256x8xbf16>,
    %12 = vector.extract_strided_slice %5 {offsets = [2, 0, 0], sizes = [16, 16, 8], strides = [1, 1, 1]} : vector<18x16x8xbf16> to vector<16x16x8xbf16>
    %13 = vector.shape_cast %12 : vector<16x16x8xbf16> to vector<256x8xbf16>
    %c0_5 = arith.constant 0 : index
    %c48 = arith.constant 48 : index
    %14 = vector.load %arg6[%c0_5, %c48] : memref<256x72xbf16, #tpu.memory_space<vmem>>, vector<256x8xbf16>
    tpu.vector_store %arg6[%c0_5, %c48], %13 {strides = array<i32>} : memref<256x72xbf16, #tpu.memory_space<vmem>>, vector<256x8xbf16>,
    %15 = vector.extract_strided_slice %4 {offsets = [0, 1, 0], sizes = [18, 16, 8], strides = [1, 1, 1]} : vector<18x32x8xbf16> to vector<18x16x8xbf16>
    %16 = vector.extract_strided_slice %15 {offsets = [0, 0, 0], sizes = [16, 16, 8], strides = [1, 1, 1]} : vector<18x16x8xbf16> to vector<16x16x8xbf16>
    %17 = vector.shape_cast %16 : vector<16x16x8xbf16> to vector<256x8xbf16>
    %c0_6 = arith.constant 0 : index
    %c8 = arith.constant 8 : index
    %18 = vector.load %arg6[%c0_6, %c8] : memref<256x72xbf16, #tpu.memory_space<vmem>>, vector<256x8xbf16>
    tpu.vector_store %arg6[%c0_6, %c8], %17 {strides = array<i32>} : memref<256x72xbf16, #tpu.memory_space<vmem>>, vector<256x8xbf16>,
    %19 = vector.extract_strided_slice %15 {offsets = [1, 0, 0], sizes = [16, 16, 8], strides = [1, 1, 1]} : vector<18x16x8xbf16> to vector<16x16x8xbf16>
    %20 = vector.shape_cast %19 : vector<16x16x8xbf16> to vector<256x8xbf16>
    %c0_7 = arith.constant 0 : index
    %c32 = arith.constant 32 : index
    %21 = vector.load %arg6[%c0_7, %c32] : memref<256x72xbf16, #tpu.memory_space<vmem>>, vector<256x8xbf16>
    tpu.vector_store %arg6[%c0_7, %c32], %20 {strides = array<i32>} : memref<256x72xbf16, #tpu.memory_space<vmem>>, vector<256x8xbf16>,
    %22 = vector.extract_strided_slice %15 {offsets = [2, 0, 0], sizes = [16, 16, 8], strides = [1, 1, 1]} : vector<18x16x8xbf16> to vector<16x16x8xbf16>
    %23 = vector.shape_cast %22 : vector<16x16x8xbf16> to vector<256x8xbf16>
    %c0_8 = arith.constant 0 : index
    %c56 = arith.constant 56 : index
    %24 = vector.load %arg6[%c0_8, %c56] : memref<256x72xbf16, #tpu.memory_space<vmem>>, vector<256x8xbf16>
    tpu.vector_store %arg6[%c0_8, %c56], %23 {strides = array<i32>} : memref<256x72xbf16, #tpu.memory_space<vmem>>, vector<256x8xbf16>,
    %25 = vector.extract_strided_slice %4 {offsets = [0, 2, 0], sizes = [18, 16, 8], strides = [1, 1, 1]} : vector<18x32x8xbf16> to vector<18x16x8xbf16>
    %26 = vector.extract_strided_slice %25 {offsets = [0, 0, 0], sizes = [16, 16, 8], strides = [1, 1, 1]} : vector<18x16x8xbf16> to vector<16x16x8xbf16>
    %27 = vector.shape_cast %26 : vector<16x16x8xbf16> to vector<256x8xbf16>
    %c0_9 = arith.constant 0 : index
    %c16 = arith.constant 16 : index
    %28 = vector.load %arg6[%c0_9, %c16] : memref<256x72xbf16, #tpu.memory_space<vmem>>, vector<256x8xbf16>
    tpu.vector_store %arg6[%c0_9, %c16], %27 {strides = array<i32>} : memref<256x72xbf16, #tpu.memory_space<vmem>>, vector<256x8xbf16>,
    %29 = vector.extract_strided_slice %25 {offsets = [1, 0, 0], sizes = [16, 16, 8], strides = [1, 1, 1]} : vector<18x16x8xbf16> to vector<16x16x8xbf16>
    %30 = vector.shape_cast %29 : vector<16x16x8xbf16> to vector<256x8xbf16>
    %c0_10 = arith.constant 0 : index
    %c40 = arith.constant 40 : index
    %31 = vector.load %arg6[%c0_10, %c40] : memref<256x72xbf16, #tpu.memory_space<vmem>>, vector<256x8xbf16>
    tpu.vector_store %arg6[%c0_10, %c40], %30 {strides = array<i32>} : memref<256x72xbf16, #tpu.memory_space<vmem>>, vector<256x8xbf16>,
    %32 = vector.extract_strided_slice %25 {offsets = [2, 0, 0], sizes = [16, 16, 8], strides = [1, 1, 1]} : vector<18x16x8xbf16> to vector<16x16x8xbf16>
    %33 = vector.shape_cast %32 : vector<16x16x8xbf16> to vector<256x8xbf16>
    %c0_11 = arith.constant 0 : index
    %c64 = arith.constant 64 : index
    %34 = vector.load %arg6[%c0_11, %c64] : memref<256x72xbf16, #tpu.memory_space<vmem>>, vector<256x8xbf16>
    tpu.vector_store %arg6[%c0_11, %c64], %33 {strides = array<i32>} : memref<256x72xbf16, #tpu.memory_space<vmem>>, vector<256x8xbf16>,
    %c0_12 = arith.constant 0 : index
    %c0_13 = arith.constant 0 : index
    %35 = vector.load %arg6[%c0_12, %c0_13] : memref<256x72xbf16, #tpu.memory_space<vmem>>, vector<256x72xbf16>
    %c0_14 = arith.constant 0 : index
    %c0_15 = arith.constant 0 : index
    %36 = vector.load %arg3[%c0_14, %c0_15] : memref<72x128xbf16, #tpu.memory_space<vmem>>, vector<72x128xbf16>
    %cst = arith.constant dense<0.000000e+00> : vector<256x128xf32>
    %37 = tpu.matmul %35, %36, %cst {dimension_numbers = #tpu.dot_dimension_numbers<[1], [0], [0], [1], [0, 0, 1, 1], [], []>} : vector<256x72xbf16>, vector<72x128xbf16>, vector<256x128xf32> -> vector<256x128xf32>
    %c0_16 = arith.constant 0 : index
    %c0_17 = arith.constant 0 : index
    %38 = vector.load %arg4[%c0_16, %c0_17] : memref<1x128xf32, #tpu.memory_space<vmem>>, vector<1x128xf32>
    %39 = vector.broadcast %38 : vector<1x128xf32> to vector<256x128xf32>
    %40 = arith.addf %37, %39 : vector<256x128xf32>
    %41 = arith.truncf %40 : vector<256x128xf32> to vector<256x128xbf16>
    %c0_18 = arith.constant 0 : index
    %c0_19 = arith.constant 0 : index
    %c0_20 = arith.constant 0 : index
    %42 = vector.load %arg5[%c0_18, %c0_19, %c0_20] : memref<1x256x128xbf16, #tpu.memory_space<vmem>>, vector<1x256x128xbf16>
    %43 = vector.shape_cast %42 : vector<1x256x128xbf16> to vector<256x128xbf16>
    %44 = vector.shape_cast %41 : vector<256x128xbf16> to vector<1x256x128xbf16>
    tpu.vector_store %arg5[%c0_18, %c0_19, %c0_20], %44 {strides = array<i32>} : memref<1x256x128xbf16, #tpu.memory_space<vmem>>, vector<1x256x128xbf16>,
    return
  }
  func.func @transform_0(%arg0: i32, %arg1: i32) -> (i32, i32, i32, i32) {
    %c0_i32 = arith.constant 0 : i32
    %c0_i32_0 = arith.constant 0 : i32
    %c0_i32_1 = arith.constant 0 : i32
    %c0_i32_2 = arith.constant 0 : i32
    return %arg0, %c0_i32, %c0_i32_0, %c0_i32_1 : i32, i32, i32, i32
  }
  func.func @transform_1(%arg0: i32, %arg1: i32) -> (i32, i32) {
    %c0_i32 = arith.constant 0 : i32
    %c0_i32_0 = arith.constant 0 : i32
    %c0_i32_1 = arith.constant 0 : i32
    return %c0_i32, %c0_i32_0 : i32, i32
  }
  func.func @transform_2(%arg0: i32, %arg1: i32) -> (i32, i32) {
    %c0_i32 = arith.constant 0 : i32
    %c0_i32_0 = arith.constant 0 : i32
    %c0_i32_1 = arith.constant 0 : i32
    return %c0_i32, %c0_i32_0 : i32, i32
  }
  func.func @transform_3(%arg0: i32, %arg1: i32) -> (i32, i32, i32) {
    %c0_i32 = arith.constant 0 : i32
    %c0_i32_0 = arith.constant 0 : i32
    return %arg0, %arg1, %c0_i32 : i32, i32, i32
  }
}

</mosaic_0001>

<bundles_post_ra>
// kernel: efficient_hetconv2d.1
= control target key start
LH: loop header
LB: loop body
LE: loop exit
PB: predicated region body
PF: predicated region fallthrough
CT: control target
= control target key end

     0   :  { %s2547_s12 = smov 0   ;;  %s2549_s13 = smov 0   ;;  %s3730_s0 = inlined_call_operand.vmem [shape: bf16[2,18,32,8], index: 0, kind: input, shape index: {}]   ;;  %s3731_s1 = inlined_call_operand.vmem [shape: bf16[72,128], index: 1, kind: input, shape index: {}]   ;;  %s3732_s2 = inlined_call_operand.vmem [shape: f32[1,128], index: 2, kind: input, shape index: {}]   ;;  %s3733_s3 = inlined_call_operand.vmem [shape: bf16[2,256,128], index: 3, kind: output, shape index: {}]  }
   0x1   :  { %s2551_s14 = smov 0  }
   0x2 LB: > { %s25_s15 = sadd.s32 1, %s2513_s13  ;;  %p2106_p0 = scmp.ge.s32.totalorder %s2517_s14, 1  ;;  %s2517_s14 = sphi %s2551_s14, %s13_s14   ;;  %s2513_s13 = sphi %s2549_s13, %s3778_s13   ;;  %s2509_s12 = sphi %s2547_s12, %s3777_s12  }
   0x3   : > { %p27_p1 = scmp.ge.s32.totalorder %s25_s15, 2  ;;  %p151_p2 = scmp.lt.s32.totalorder %s2517_s14, 3 }
   0x5   : > { %s3780_s15 = smov (%p27_p1, %s25_s15), 0  ;;  %p152_p3 = pnand %p2106_p0, %p151_p2 }
   0x7   : > { %155 = sbr.rel (%p152_p3) target bundleno = 624 (0x270), region = 32 }
   0xe   : > { %p179_p4 = scmp.lt.s32.totalorder %s2509_s12, 1  ;;  %vm349_vm0 = vcmask 64512   ;;  %s2519_s20 = smov 24   ;;  %vm506_vm1 = vsmask.f32 3328  ;;  %vm1206_vm4 = vcmask 1042432  }
   0xf   : > { %vm507_vm2 = vsmask.f32 7440  ;;  %s2520_s21 = smov 48   ;;  %s2521_s22 = smov 8   ;;  %vm1207_vm5 = vcmask 1046532   ;;  %vm1694_vm7 = vcmask 1043456  }
  0x10   : > { %s3782_s12 = smov (!%p179_p4, %s2509_s12), 1  ;;  %vm2720_vm3 = vmor %vm506_vm1, %vm507_vm2  ;;  %s2522_s23 = smov 32   ;;  %vm419_vm8 = vcmask 261312   ;;  %vm489_vm9 = vcmask 458112   ;;  %vm989_vm10 = vcmask 130112   ;;  %vm1081_vm11 = vcmask 326912  }
  0x11   : > { %s2441_s16 = smul.u32 288, %s3782_s12  ;;  %vm2827_vm6 = vmor %vm1206_vm4, %vm1207_vm5  ;;  %s2523_s24 = smov 56   ;;  %vm1173_vm12 = vcmask 523712   ;;  %vm1417_vm13 = vcmask 195712   ;;  %vm1493_vm14 = vcmask 392512   ;;  %vm1569_vm15 = vcmask 589312  }
  0x12   : > { %s2524_s27 = smov 16   ;;  %s2525_s5 = smov 40  }
  0x13   : > { %s2571_s19 = scalar_lea.vmem %s3730_s0, %s2441_s16  ;;  %s2526_s8 = smov 64  }
  0x14   : > { %v2574_v0 = vld [vmem:[%s2571_s19 + $0x20] sm:$0xf]  ;;  %v2577_v1 = vld [vmem:[%s2571_s19 + $0x24] sm:$0xf]  ;;  %v2580_v2 = vld [vmem:[%s2571_s19 + $0x10] sm:$0xf] }
  0x15   : > { %v2584_v3 = vcombine.low %v2574_v0, %v2577_v1  ;;  %v558_v4 = vshrl.u32 %v2574_v0, 16  ;;  %v561_v5 = vshll.u32 %v2574_v0, 16  ;;  %v571_v6 = vshrl.u32 %v2577_v1, 16  ;;  %v2590_v7 = vld [vmem:[%s2571_s19 + $0x14] sm:$0xf]  ;;  %s2238_s17 = sshll.u32 %s3782_s12, 7 }
  0x16   : > { %v2111_v8 = vcombine.low %v2580_v2, %v2590_v7  ;;  %v534_v9 = vshrl.u32 %v2580_v2, 16  ;;  %v537_v10 = vshll.u32 %v2580_v2, 16  ;;  %v543_v11 = vshll.u32 %v2590_v7, 16  ;;  %v2598_v12 = vld [vmem:[%s2571_s19 + $0xa0] sm:$0xf] }
  0x17   : > { %373 = vrot.lane.b32.xlu1 %v2584_v3, %s2519_s20  ;;  %v547_v13 = vshrl.u32 %v2590_v7, 16  ;;  %352 = vst.msk [vmem:[#allocation2 + $0x10] sm:$0xff] %vm349_vm0, %v2584_v3  ;;  %v2606_v14 = vld [vmem:[%s2571_s19 + $0xa4] sm:$0xf]  ;;  %v750_v15 = vshrl.u32 %v2598_v12, 16  ;;  %v753_v16 = vshll.u32 %v2598_v12, 16 }
  0x18   : > { %v2610_v17 = vrot.slane %v558_v4, 4  ;;  %v2612_v18 = vrot.slane %v534_v9, 4  ;;  %v2614_v19 = vrot.slane %v537_v10, 5  ;;  %371 = vrot.lane.b32.xlu0 %v2111_v8, %s2519_s20  ;;  %351 = vst.msk [vmem:[#allocation2 + $0x8] sm:$0xff] %vm349_vm0, %v2111_v8  ;;  %v2120_v20 = vcombine.low %v2598_v12, %v2606_v14  ;;  %v2622_v22 = vld [vmem:[%s2571_s19 + $0x90] sm:$0xf] }
  0x19   : > { %v763_v21 = vshrl.u32 %v2606_v14, 16  ;;  %v2624_v23 = vrot.slane %v547_v13, 4  ;;  %v2627_v24 = vld [vmem:[%s2571_s19 + $0x94] sm:$0xf]  ;;  %v726_v25 = vshrl.u32 %v2622_v22, 16  ;;  %v729_v26 = vshll.u32 %v2622_v22, 16 }
  0x1a   : > { %v2631_v27 = vrot.slane %v543_v11, 5  ;;  %360 = vst.msk [vmem:[#allocation2 + $0x50] sm:$0xff] %vm349_vm0, %v2120_v20  ;;  %v2636_v28 = vcombine.low %v2622_v22, %v2627_v24  ;;  %v739_v29 = vshrl.u32 %v2627_v24, 16  ;;  %v2640_v30 = vld [vmem:[%s2571_s19 + $0xb0] sm:$0xf]  ;;  %v735_v32 = vshll.u32 %v2627_v24, 16 }
  0x1b   : > { %v2643_v31 = vld [vmem:[%s2571_s19 + $0xb4] sm:$0xf]  ;;  %389 = vrot.lane.b32.xlu1 %v2120_v20, %s2519_s20  ;;  %v774_v34 = vshrl.u32 %v2640_v30, 16  ;;  %v777_v35 = vshll.u32 %v2640_v30, 16  ;;  %v2655_v37 = vld [vmem:[%s2571_s19 + $0x30] sm:$0xf]  ;;  %v540_v47 = vor.u32 %v2614_v19, %v2612_v18 }
  0x1c   : > { %3750 = vst [vmem:[#allocation3_spill] sm:$0xff] %v2636_v28  ;;  %v2649_v33 = vcombine.low %v2640_v30, %v2643_v31  ;;  %v787_v36 = vshrl.u32 %v2643_v31, 16  ;;  %387 = vrot.lane.b32.xlu0 %v2636_v28, %s2519_s20  ;;  %359 = vst.msk [vmem:[#allocation2 + $0x48] sm:$0xff] %vm349_vm0, %v2636_v28  ;;  %v2662_v38 = vld [vmem:[%s2571_s19 + $0x34] sm:$0xf]  ;;  %v582_v39 = vshrl.u32 %v2655_v37, 16  ;;  %v550_v57 = vor.u32 %v2624_v23, %v2631_v27 }
  0x1d   : > { %v585_v40 = vshll.u32 %v2655_v37, 16  ;;  %v2667_v41 = vld [vmem:[%s2571_s19 + $0x80] sm:$0xf]  ;;  %v2673_v42 = vcombine.low %v2655_v37, %v2662_v38  ;;  %v595_v43 = vshrl.u32 %v2662_v38, 16  ;;  %v2677_v44 = vld [vmem:[%s2571_s19 + $0x84] sm:$0xf] }
  0x1e   : > { %361 = vst.msk [vmem:[#allocation2 + $0x58] sm:$0xff] %vm349_vm0, %v2649_v33  ;;  %v2680_v45 = vld [vmem:[%s2571_s19 + $0x88] sm:$0xf]  ;;  %v702_v46 = vshrl.u32 %v2667_v41, 16  ;;  %v705_v48 = vshll.u32 %v2667_v41, 16  ;;  %v711_v49 = vshll.u32 %v2677_v44, 16  ;;  %v2706_v58 = vcombine.low %v2667_v41, %v2677_v44 }
  0x1f   : > { %v715_v50 = vshrl.u32 %v2677_v44, 16  ;;  %v721_v51 = vshll.u32 %v2680_v45, 16  ;;  %v2690_v52 = vld [vmem:[%s2571_s19] sm:$0xf]  ;;  %457 = vrot.lane.b32.xlu1 %v2120_v20, %s2520_s21  ;;  %353 = vst.msk [vmem:[#allocation2 + $0x18] sm:$0xff] %vm349_vm0, %v2673_v42 }
  0x20   : > { %v704_v53 = vrot.slane %v702_v46, 4  ;;  %v2696_v54 = vld [vmem:[%s2571_s19 + $0x4] sm:$0xf]  ;;  %v2699_v55 = vld [vmem:[%s2571_s19 + $0x8] sm:$0xf]  ;;  %v510_v56 = vshrl.u32 %v2690_v52, 16  ;;  %441 = vrot.lane.b32.xlu0 %v2584_v3, %s2520_s21 }
  0x21   : > { %3751 = vst [vmem:[#allocation4_spill] sm:$0xff] %v2706_v58  ;;  %v707_v59 = vrot.slane %v705_v48, 5  ;;  %v713_v60 = vrot.slane %v711_v49, 5  ;;  %v717_v61 = vrot.slane %v715_v50, 4  ;;  %v723_v62 = vrot.slane %v721_v51, 5  ;;  %358 = vst.msk [vmem:[#allocation2 + $0x40] sm:$0xff] %vm349_vm0, %v2706_v58 }
  0x22   : > { %v512_v63 = vrot.slane %v510_v56, 4  ;;  %v513_v4 = vshll.u32 %v2690_v52, 16  ;;  %v519_v8 = vshll.u32 %v2696_v54, 16  ;;  %v523_v9 = vshrl.u32 %v2696_v54, 16  ;;  %v2725_v46 = vld [vmem:[%s2571_s19 + $0x98] sm:$0xf] }
  0x23   : > { %v708_v10 = vor.u32 %v707_v59, %v704_v53  ;;  %v718_v11 = vor.u32 %v717_v61, %v713_v60  ;;  %v529_v13 = vshll.u32 %v2699_v55, 16  ;;  %v728_v3 = vrot.slane %v726_v25, 4  ;;  %459 = vrot.lane.b32.xlu1 %v2649_v33, %s2520_s21 }
  0x24   : > { %v515_v19 = vrot.slane %v513_v4, 5  ;;  %v521_v20 = vrot.slane %v519_v8, 5  ;;  %v525_v23 = vrot.slane %v523_v9, 4  ;;  %v731_v48 = vrot.slane %v729_v26, 5  ;;  %443 = vrot.lane.b32.xlu0 %v2673_v42, %s2520_s21  ;;  %v2737_v9 = vld [vmem:[%s2571_s19 + $0x18] sm:$0xf] }
  0x25   : > { %v709_v25 = vrot.slane %v708_v10, 4  ;;  %v719_v49 = vrot.slane %v718_v11, 4  ;;  %v531_v50 = vrot.slane %v529_v13, 5  ;;  %v737_v51 = vrot.slane %v735_v32, 5 }
  0x26   : > { %v516_v53 = vor.u32 %v515_v19, %v512_v63  ;;  %v526_v56 = vor.u32 %v525_v23, %v521_v20  ;;  %v732_v59 = vor.u32 %v731_v48, %v728_v3  ;;  %v741_v61 = vrot.slane %v739_v29, 4  ;;  %v2745_v23 = vld [vmem:[%s2571_s19 + $0xa8] sm:$0xf] }
  0x27   : > { %v714_v4 = vsel %vm2720_vm3, %v709_v25, %v713_v60  ;;  %v724_v26 = vsel %vm2720_vm3, %v719_v49, %v723_v62  ;;  %v745_v8 = vshll.u32 %v2725_v46, 16  ;;  %v541_v10 = vrot.slane %v540_v47, 4 }
  0x28   : > { %v2739_v11 = vcombine.low %v714_v4, %v724_v26  ;;  %v517_v32 = vrot.slane %v516_v53, 4  ;;  %v527_v63 = vrot.slane %v526_v56, 4  ;;  %v733_v13 = vrot.slane %v732_v59, 4  ;;  %v2768_v4 = vld [vmem:[%s2571_s19 + $0x28] sm:$0xf] }
  0x29   : > { %v742_v3 = vor.u32 %v741_v61, %v737_v51  ;;  %v747_v19 = vrot.slane %v745_v8, 5  ;;  %v546_v29 = vsel %vm2720_vm3, %v541_v10, %v2631_v27  ;;  %v551_v60 = vrot.slane %v550_v57, 4 }
  0x2a   : > { %3754 = vst [vmem:[#allocation5_spill] sm:$0xff] %v2739_v11  ;;  %957 = vrot.lane.b32.xlu1 %v2739_v11, %s2521_s22  ;;  %v522_v47 = vsel %vm2720_vm3, %v517_v32, %v521_v20  ;;  %v532_v62 = vsel %vm2720_vm3, %v527_v63, %v531_v50  ;;  %v738_v48 = vsel %vm2720_vm3, %v733_v13, %v737_v51  ;;  %v553_v25 = vshll.u32 %v2737_v9, 16 }
  0x2b   : > { %v2128_v27 = vcombine.low %v522_v47, %v532_v62  ;;  %v743_v57 = vrot.slane %v742_v3, 4  ;;  %v752_v49 = vrot.slane %v750_v15, 4  ;;  %v755_v53 = vrot.slane %v753_v16, 5  ;;  %v2784_v62 = vld [vmem:[%s2571_s19 + $0xb8] sm:$0xf] }
  0x2c   : > { %v555_v56 = vrot.slane %v553_v25, 5  ;;  %v759_v59 = vshll.u32 %v2606_v14, 16  ;;  %v765_v20 = vrot.slane %v763_v21, 4  ;;  %v769_v50 = vshll.u32 %v2745_v23, 16 }
  0x2d   : > { %941 = vrot.lane.b32.xlu0 %v2128_v27, %s2521_s22  ;;  %v748_v51 = vsel %vm2720_vm3, %v743_v57, %v747_v19  ;;  %v756_v61 = vor.u32 %v755_v53, %v752_v49  ;;  %v563_v15 = vrot.slane %v561_v5, 5  ;;  %v567_v16 = vshll.u32 %v2577_v1, 16 }
  0x2e   : > { %v2773_v26 = vcombine.low %v738_v48, %v748_v51  ;;  %v556_v21 = vsel %vm2720_vm3, %v551_v60, %v555_v56  ;;  %v761_v8 = vrot.slane %v759_v59, 5  ;;  %v771_v10 = vrot.slane %v769_v50, 5  ;;  %v2804_v50 = vld [vmem:[%s2571_s19 + $0x38] sm:$0xf] }
  0x2f   : > { %v2129_v32 = vcombine.low %v546_v29, %v556_v21  ;;  %v757_v63 = vrot.slane %v756_v61, 4  ;;  %v564_v13 = vor.u32 %v563_v15, %v2610_v17  ;;  %v569_v3 = vrot.slane %v567_v16, 5 }
  0x30   : > { %3755 = vst [vmem:[#allocation6_spill] sm:$0xff] %v2773_v26  ;;  %959 = vrot.lane.b32.xlu1 %v2773_v26, %s2521_s22  ;;  %v766_v5 = vor.u32 %v765_v20, %v761_v8  ;;  %v573_v19 = vrot.slane %v571_v6, 4  ;;  %v577_v47 = vshll.u32 %v2768_v4, 16  ;;  %v776_v60 = vrot.slane %v774_v34, 4 }
  0x31   : > { %943 = vrot.lane.b32.xlu0 %v2129_v32, %s2521_s22  ;;  %v762_v17 = vsel %vm2720_vm3, %v757_v63, %v761_v8  ;;  %v565_v29 = vrot.slane %v564_v13, 4  ;;  %v779_v48 = vrot.slane %v777_v35, 5  ;;  %v783_v25 = vshll.u32 %v2643_v31, 16 }
  0x32   : > { %v767_v6 = vrot.slane %v766_v5, 4  ;;  %v574_v27 = vor.u32 %v573_v19, %v569_v3  ;;  %v579_v57 = vrot.slane %v577_v47, 5  ;;  %v789_v49 = vrot.slane %v787_v36, 4 }
  0x33   : > { %v570_v34 = vsel %vm2720_vm3, %v565_v29, %v569_v3  ;;  %v780_v53 = vor.u32 %v779_v48, %v776_v60  ;;  %v785_v56 = vrot.slane %v783_v25, 5  ;;  %v793_v59 = vshll.u32 %v2784_v62, 16 }
  0x34   : > { %1049 = vrot.lane.b32.xlu1 %v2773_v26, %s2522_s23  ;;  %v772_v35 = vsel %vm2720_vm3, %v767_v6, %v771_v10  ;;  %v575_v20 = vrot.slane %v574_v27, 4  ;;  %v584_v36 = vrot.slane %v582_v39, 4  ;;  %v587_v51 = vrot.slane %v585_v40, 5 }
  0x35   : > { %1033 = vrot.lane.b32.xlu0 %v2129_v32, %s2522_s23  ;;  %v2811_v61 = vcombine.low %v762_v17, %v772_v35  ;;  %v781_v15 = vrot.slane %v780_v53, 4  ;;  %v790_v16 = vor.u32 %v789_v49, %v785_v56  ;;  %v795_v21 = vrot.slane %v793_v59, 5 }
  0x36   : > { %v580_v8 = vsel %vm2720_vm3, %v575_v20, %v579_v57  ;;  %v588_v10 = vor.u32 %v587_v51, %v584_v36  ;;  %v591_v63 = vshll.u32 %v2662_v38, 16  ;;  %v597_v13 = vrot.slane %v595_v43, 4 }
  0x37   : > { %v2818_v39 = vcombine.low %v570_v34, %v580_v8  ;;  %v786_v40 = vsel %vm2720_vm3, %v781_v15, %v785_v56  ;;  %v791_v32 = vrot.slane %v790_v16, 4  ;;  %v601_v3 = vshll.u32 %v2804_v50, 16  ;;  %v3774_v18 = vld [vmem:[#allocation6_spill] sm:$0xff] }
  0x38   : > { %1051 = vrot.lane.b32.xlu1 %v2811_v61, %s2522_s23  ;;  %v589_v5 = vrot.slane %v588_v10, 4  ;;  %v593_v19 = vrot.slane %v591_v63, 5  ;;  %v2154_v43 = vrot.slane %v2667_v41, 9  ;;  %v1267_v60 = vrot.slane %v2677_v44, 5 }
  0x39   : > { %1035 = vrot.lane.b32.xlu0 %v2818_v39, %s2522_s23  ;;  %v796_v17 = vsel %vm2720_vm3, %v791_v32, %v795_v21  ;;  %v603_v29 = vrot.slane %v601_v3, 5  ;;  %v1270_v48 = vrot.slane %v2680_v45, 5  ;;  %v2146_v57 = vrot.slane %v2690_v52, 9 }
  0x3a   : > { %v2838_v25 = vcombine.low %v786_v40, %v796_v17  ;;  %v594_v6 = vsel %vm2720_vm3, %v589_v5, %v593_v19  ;;  %v598_v27 = vor.u32 %v597_v13, %v593_v19  ;;  %v1268_v41 = vsel %vm2827_vm6, %v2154_v43, %v1267_v60  ;;  %v2887_v19 = vld [vmem:[%s2571_s19 + $0xc0] sm:$0xf]  ;;  %v2895_v17 = vld [vmem:[%s2571_s19 + $0xc4] sm:$0xf] }
  0x3b   : > { %v1269_v44 = vrot.slane %v1267_v60, 4  ;;  %v1211_v49 = vrot.slane %v2696_v54, 5  ;;  %v1214_v34 = vrot.slane %v2699_v55, 5  ;;  %v2155_v53 = vrot.slane %v2622_v22, 9  ;;  %v2488_v43 = vld [vmem:[%s3731_s1] sm:$0xff]  }
  0x3c   : > { %1141 = vrot.lane.b32.xlu1 %v2811_v61, %s2523_s24  ;;  %v599_v45 = vrot.slane %v598_v27, 4  ;;  %v1274_v56 = vrot.slane %v2627_v24, 5  ;;  %v2147_v59 = vrot.slane %v2580_v2, 9  ;;  %v1277_v55 = vrot.slane %v2725_v46, 5  ;;  %2387 = vmatprep.subr.bf16.mxu0 %v2488_v43 }
  0x3d   : > { %1125 = vrot.lane.b32.xlu0 %v2818_v39, %s2523_s24  ;;  %v1271_v35 = vsel %vm2827_vm6, %v1269_v44, %v1270_v48  ;;  %v1213_v20 = vrot.slane %v1211_v49, 4  ;;  %v1218_v36 = vrot.slane %v2590_v7, 5  ;;  %v1212_v22 = vsel %vm2827_vm6, %v2146_v57, %v1211_v49  ;;  %v2909_v48 = vld [vmem:[%s2571_s19 + $0x44] sm:$0xf]  ;;  %2429 = vmatprep.subr.bf16.mxu1 %v2488_v43  ;;  %v2920_v57 = vld [vmem:[%s2571_s19 + $0xd0] sm:$0xf] }
  0x3e   : > { %v604_v51 = vsel %vm2720_vm3, %v599_v45, %v603_v29  ;;  %v1276_v24 = vrot.slane %v1274_v56, 4  ;;  %v2868_v46 = vcombine.low %v1268_v41, %v1271_v35  ;;  %v1275_v7 = vsel %vm2827_vm6, %v2155_v53, %v1274_v56  ;;  %v2923_v41 = vld [vmem:[%s2571_s19 + $0xd4] sm:$0xf]  ;;  %2388 = vmatpush3.bf16.msra.mxu0 %v2488_v43  ;;  %2434 = vmatpush3.bf16.msra.mxu1 %v2488_v43  ;;  %v2489_v44 = vld [vmem:[%s3731_s1 + $0x8] sm:$0xff]   ;;  %v2935_v56 = vld [vmem:[%s2571_s19 + $0x50] sm:$0xf] }
  0x3f   : > { %v2862_v15 = vcombine.low %v594_v6, %v604_v51  ;;  %v1215_v2 = vsel %vm2827_vm6, %v1213_v20, %v1214_v34  ;;  %v1220_v16 = vrot.slane %v1218_v36, 4  ;;  %v1219_v21 = vsel %vm2827_vm6, %v2147_v59, %v1218_v36  ;;  %2389 = vmatprep.subr.bf16.mxu0 %v2489_v44  ;;  %2430 = vmatprep.subr.bf16.mxu1 %v2489_v44  ;;  %v3011_v53 = vld [vmem:[%s2571_s19 + $0xd8] sm:$0xf] }
  0x40   : > { %1143 = vrot.lane.b32.xlu1 %v2838_v25, %s2523_s24  ;;  %3758 = vst [vmem:[#allocation7_spill] sm:$0xff] %v2868_v46  ;;  %v1221_v8 = vrot.slane %v2737_v9, 5  ;;  %v2162_v10 = vcombine.low %v1212_v22, %v1215_v2  ;;  %v1278_v63 = vsel %vm2827_vm6, %v1276_v24, %v1277_v55  ;;  %v2156_v13 = vrot.slane %v2598_v12, 9 }
  0x41   : > { %1127 = vrot.lane.b32.xlu0 %v2862_v15, %s2523_s24  ;;  %v1281_v40 = vrot.slane %v2606_v14, 5  ;;  %v1284_v3 = vrot.slane %v2745_v23, 5  ;;  %v2148_v5 = vrot.slane %v2574_v0, 9  ;;  %v1225_v9 = vrot.slane %v2577_v1, 5 }
  0x42   : > { %v1222_v32 = vsel %vm2827_vm6, %v1220_v16, %v1221_v8  ;;  %v2157_v14 = vrot.slane %v2640_v30, 9  ;;  %v1288_v60 = vrot.slane %v2643_v31, 5  ;;  %v2899_v0 = vcombine.low %v1275_v7, %v1278_v63  ;;  %v2906_v31 = vld [vmem:[%s2571_s19 + $0x40] sm:$0xf]  ;;  %v2966_v8 = vld [vmem:[%s2571_s19 + $0xc8] sm:$0xf]  ;;  %2390 = vmatpush3.bf16.msra.mxu0 %v2489_v44  ;;  %2435 = vmatpush3.bf16.msra.mxu1 %v2489_v44 }
  0x43   : > { %v1283_v12 = vrot.slane %v1281_v40, 4  ;;  %v1227_v1 = vrot.slane %v1225_v9, 4  ;;  %v1228_v23 = vrot.slane %v2768_v4, 5  ;;  %v2163_v29 = vcombine.low %v1219_v21, %v1222_v32 }
  0x44   : > { %1385 = vrot.lane.b32.xlu1 %v2868_v46, %s2524_s27  ;;  %3759 = vst [vmem:[#allocation8_spill] sm:$0xff] %v2899_v0  ;;  %v1282_v30 = vsel %vm2827_vm6, %v2156_v13, %v1281_v40  ;;  %v1226_v27 = vsel %vm2827_vm6, %v2148_v5, %v1225_v9  ;;  %v2917_v4 = vcombine.low %v2887_v19, %v2895_v17  ;;  %v1290_v34 = vrot.slane %v1288_v60, 4 }
  0x45   : > { %1369 = vrot.lane.b32.xlu0 %v2162_v10, %s2524_s27  ;;  %v1285_v6 = vsel %vm2827_vm6, %v1283_v12, %v1284_v3  ;;  %v2930_v49 = vsel %vm2827_vm6, %v2157_v14, %v1288_v60  ;;  %v1291_v45 = vrot.slane %v2784_v62, 5  ;;  %v1229_v59 = vsel %vm2827_vm6, %v1227_v1, %v1228_v23  ;;  %v2947_v62 = vld [vmem:[%s2571_s19 + $0x54] sm:$0xf]  ;;  %v2990_v12 = vld [vmem:[%s2571_s19 + $0x48] sm:$0xf] }
  0x46   : > { %v3734_v35 = vrot.slane %v2662_v38, 5  ;;  %v798_v20 = vshrl.u32 %v2887_v19, 16  ;;  %v801_v55 = vshll.u32 %v2887_v19, 16  ;;  %362 = vst.msk [vmem:[#allocation2 + $0x60] sm:$0xff] %vm349_vm0, %v2917_v4  ;;  %v2950_v36 = vcombine.low %v1282_v30, %v1285_v6  ;;  %v2490_v10 = vld [vmem:[%s3731_s1 + $0x10] sm:$0xff]  }
  0x47   : > { %v811_v51 = vshrl.u32 %v2895_v17, 16  ;;  %v2955_v22 = vcombine.low %v2906_v31, %v2909_v48  ;;  %v606_v24 = vshrl.u32 %v2906_v31, 16  ;;  %v609_v16 = vshll.u32 %v2906_v31, 16  ;;  %2391 = vmatprep.subr.bf16.mxu0 %v2490_v10  ;;  %2431 = vmatprep.subr.bf16.mxu1 %v2490_v10 }
  0x48   : > { %1387 = vrot.lane.b32.xlu1 %v2899_v0, %s2524_s27  ;;  %v619_v7 = vshrl.u32 %v2909_v48, 16  ;;  %v2963_v21 = vcombine.low %v2920_v57, %v2923_v41  ;;  %v2971_v63 = vcombine.low %v1226_v27, %v1229_v59  ;;  %v1292_v13 = vsel %vm2827_vm6, %v1290_v34, %v1291_v45  ;;  %2392 = vmatpush3.bf16.msra.mxu0 %v2490_v10 }
  0x49   : > { %1371 = vrot.lane.b32.xlu0 %v2163_v29, %s2524_s27  ;;  %354 = vst.msk [vmem:[#allocation2 + $0x20] sm:$0xff] %vm349_vm0, %v2955_v22  ;;  %v822_v40 = vshrl.u32 %v2920_v57, 16  ;;  %v2980_v32 = vcombine.low %v2935_v56, %v2947_v62  ;;  %v1234_v3 = vrot.slane %v3734_v35, 4  ;;  %v825_v5 = vshll.u32 %v2920_v57, 16  ;;  %2436 = vmatpush3.bf16.msra.mxu1 %v2490_v10 }
  0x4a   : > { %363 = vst.msk [vmem:[#allocation2 + $0x68] sm:$0xff] %vm349_vm0, %v2963_v21  ;;  %v800_v9 = vrot.slane %v798_v20, 4  ;;  %v803_v43 = vrot.slane %v801_v55, 5  ;;  %v807_v14 = vshll.u32 %v2895_v17, 16  ;;  %v813_v60 = vrot.slane %v811_v51, 4 }
  0x4b   : > { %355 = vst.msk [vmem:[#allocation2 + $0x28] sm:$0xff] %vm349_vm0, %v2980_v32  ;;  %v817_v1 = vshll.u32 %v2966_v8, 16  ;;  %v608_v23 = vrot.slane %v606_v24, 4  ;;  %v611_v6 = vrot.slane %v609_v16, 5  ;;  %v615_v27 = vshll.u32 %v2909_v48, 16  ;;  %v3776_v47 = vld [vmem:[#allocation8_spill] sm:$0xff] }
  0x4c   : > { %1461 = vrot.lane.b32.xlu1 %v2899_v0, %s2525_s5  ;;  %v804_v30 = vor.u32 %v803_v43, %v800_v9  ;;  %v621_v44 = vrot.slane %v619_v7, 4  ;;  %v835_v34 = vshrl.u32 %v2923_v41, 16  ;;  %v809_v45 = vrot.slane %v807_v14, 5 }
  0x4d   : > { %1445 = vrot.lane.b32.xlu0 %v2163_v29, %s2525_s5  ;;  %v2491_v29 = vld [vmem:[%s3731_s1 + $0x18] sm:$0xff]   ;;  %v625_v59 = vshll.u32 %v2990_v12, 16  ;;  %v824_v20 = vrot.slane %v822_v40, 4  ;;  %v630_v55 = vshrl.u32 %v2935_v56, 16  ;;  %v612_v51 = vor.u32 %v611_v6, %v608_v23 }
  0x4e   : > { %v617_v24 = vrot.slane %v615_v27, 5  ;;  %v827_v16 = vrot.slane %v825_v5, 5  ;;  %2393 = vmatprep.subr.bf16.mxu0 %v2491_v29  ;;  %v633_v7 = vshll.u32 %v2935_v56, 16  ;;  %v805_v10 = vrot.slane %v804_v30, 4  ;;  %2432 = vmatprep.subr.bf16.mxu1 %v2491_v29 }
  0x4f   : > { %v814_v9 = vor.u32 %v813_v60, %v809_v45  ;;  %v831_v43 = vshll.u32 %v2923_v41, 16  ;;  %v819_v40 = vrot.slane %v817_v1, 5  ;;  %v627_v2 = vrot.slane %v625_v59, 5  ;;  %2394 = vmatpush3.bf16.msra.mxu0 %v2491_v29  ;;  %2437 = vmatpush3.bf16.msra.mxu1 %v2491_v29 }
  0x50   : > { %1463 = vrot.lane.b32.xlu1 %v2950_v36, %s2525_s5  ;;  %v622_v14 = vor.u32 %v621_v44, %v617_v24  ;;  %v828_v35 = vor.u32 %v827_v16, %v824_v20  ;;  %v613_v23 = vrot.slane %v612_v51, 4  ;;  %v837_v27 = vrot.slane %v835_v34, 4 }
  0x51   : > { %1447 = vrot.lane.b32.xlu0 %v2971_v63, %s2525_s5  ;;  %v815_v5 = vrot.slane %v814_v9, 4  ;;  %v3013_v6 = vrot.slane %v831_v43, 5  ;;  %v3760_v60 = vrot.slane %v2662_v38, 5  ;;  %v3761_v1 = vrot.slane %v2655_v37, 9 }
  0x52   : > { %v3762_v44 = vrot.slane %v2804_v50, 5  ;;  %v623_v59 = vrot.slane %v622_v14, 4  ;;  %v3030_v34 = vcombine.low %v2930_v49, %v1292_v13  ;;  %v810_v38 = vsel %vm2720_vm3, %v805_v10, %v809_v45 }
  0x53   : > { %v1233_v30 = vsel %vm2827_vm6, %v3761_v1, %v3760_v60  ;;  %v841_v37 = vshll.u32 %v3011_v53, 16  ;;  %v820_v20 = vsel %vm2720_vm3, %v815_v5, %v819_v40  ;;  %v3037_v51 = vrot.slane %v828_v35, 4  ;;  %v216_v40 = vld [vmem:[%s2571_s19 + $0x58] sm:$0xf] }
  0x54   : > { %1537 = vrot.lane.b32.xlu1 %v2950_v36, %s2526_s8  ;;  %v1236_v29 = vsel %vm2827_vm6, %v1234_v3, %v3762_v44  ;;  %v632_v50 = vrot.slane %v630_v55, 4  ;;  %v635_v16 = vrot.slane %v633_v7, 5  ;;  %v618_v9 = vsel %vm2720_vm3, %v613_v23, %v617_v24  ;;  %v3089_v44 = vld [vmem:[%s2571_s19 + $0xe0] sm:$0xf] }
  0x55   : > { %1521 = vrot.lane.b32.xlu0 %v2971_v63, %s2526_s8  ;;  %v3039_v3 = vcombine.low %v1233_v30, %v1236_v29  ;;  %v628_v49 = vsel %vm2720_vm3, %v623_v59, %v627_v2  ;;  %v838_v13 = vor.u32 %v837_v27, %v3013_v6  ;;  %v643_v45 = vshrl.u32 %v2947_v62, 16  ;;  %v3092_v29 = vld [vmem:[%s2571_s19 + $0xe4] sm:$0xf] }
  0x56   : > { %v639_v35 = vshll.u32 %v2947_v62, 16  ;;  %v2110_v55 = vcombine.low %v2690_v52, %v2696_v54  ;;  %v2158_v7 = vrot.slane %v2887_v19, 9  ;;  %v3055_v24 = vcombine.low %v810_v38, %v820_v20  ;;  %v3099_v38 = vld [vmem:[%s2571_s19 + $0x60] sm:$0xf] }
  0x57   : > { %v3057_v2 = vrot.slane %v841_v37, 5  ;;  %v1295_v10 = vrot.slane %v2895_v17, 5  ;;  %v3061_v43 = vcombine.low %v618_v9, %v628_v49  ;;  %v636_v54 = vor.u32 %v635_v16, %v632_v50  ;;  %v3107_v9 = vld [vmem:[%s2571_s19 + $0x64] sm:$0xf] }
  0x58   : > { %391 = vrot.lane.b32.xlu1 %v2649_v33, %s2519_s20  ;;  %v1298_v33 = vrot.slane %v2966_v8, 5  ;;  %350 = vst.msk [vmem:[#allocation2] sm:$0xff] %vm349_vm0, %v2110_v55  ;;  %v3069_v19 = vrot.slane %v838_v13, 4  ;;  %v1239_v14 = vrot.slane %v2909_v48, 5  ;;  %v3077_v5 = vrot.slane %v639_v35, 5 }
  0x59   : > { %375 = vrot.lane.b32.xlu0 %v2673_v42, %s2519_s20  ;;  %v2150_v42 = vrot.slane %v2906_v31, 9  ;;  %v1296_v17 = vsel %vm2827_vm6, %v2158_v7, %v1295_v10  ;;  %v1297_v8 = vrot.slane %v1295_v10, 4  ;;  %v1242_v23 = vrot.slane %v2990_v12, 5  ;;  %v3127_v7 = vld [vmem:[%s2571_s19 + $0xf0] sm:$0xf] }
  0x5a   : > { %v2159_v31 = vrot.slane %v2920_v57, 9  ;;  %v1302_v27 = vrot.slane %v2923_v41, 5  ;;  %v645_v60 = vrot.slane %v643_v45, 4  ;;  %v1241_v30 = vrot.slane %v1239_v14, 4  ;;  %v3130_v10 = vld [vmem:[%s2571_s19 + $0xf4] sm:$0xf] }
  0x5b   : > { %v1299_v48 = vsel %vm2827_vm6, %v1297_v8, %v1298_v33  ;;  %v1240_v1 = vsel %vm2827_vm6, %v2150_v42, %v1239_v14  ;;  %v649_v12 = vshll.u32 %v216_v40, 16  ;;  %v1305_v20 = vrot.slane %v3011_v53, 5  ;;  %v3150_v8 = vld [vmem:[%s2571_s19 + $0x74] sm:$0xf] }
  0x5c   : > { %1539 = vrot.lane.b32.xlu1 %v3030_v34, %s2526_s8  ;;  %v3094_v57 = vcombine.low %v1296_v17, %v1299_v48  ;;  %v1303_v41 = vsel %vm2827_vm6, %v2159_v31, %v1302_v27  ;;  %v1304_v59 = vrot.slane %v1302_v27, 4  ;;  %v1243_v37 = vsel %vm2827_vm6, %v1241_v30, %v1242_v23  ;;  %v3147_v17 = vld [vmem:[%s2571_s19 + $0x70] sm:$0xf] }
  0x5d   : > { %1523 = vrot.lane.b32.xlu0 %v3039_v3, %s2526_s8  ;;  %v2151_v50 = vrot.slane %v2935_v56, 9  ;;  %v1246_v16 = vrot.slane %v2947_v62, 5  ;;  %v3111_v49 = vrot.slane %v636_v54, 4  ;;  %v3113_v13 = vcombine.low %v1240_v1, %v1243_v37  ;;  %v3180_v37 = vld [vmem:[%s2571_s19 + $0xe8] sm:$0xf] }
  0x5e   : > { %v1249_v45 = vrot.slane %v216_v40, 5  ;;  %v3117_v35 = vcombine.low %v3089_v44, %v3092_v29  ;;  %v646_v53 = vor.u32 %v645_v60, %v3077_v5  ;;  %v1306_v56 = vsel %vm2827_vm6, %v1304_v59, %v1305_v20 }
  0x5f   : > { %v1247_v62 = vsel %vm2827_vm6, %v2151_v50, %v1246_v16  ;;  %v1248_v55 = vrot.slane %v1246_v16, 4  ;;  %v3136_v54 = vrot.slane %v649_v12, 5  ;;  %v3138_v42 = vcombine.low %v1303_v41, %v1306_v56 }
  0x60   : > { %393 = vrot.lane.b32.xlu1 %v2917_v4, %s2519_s20  ;;  %364 = vst.msk [vmem:[#allocation2 + $0x70] sm:$0xff] %vm349_vm0, %v3117_v35  ;;  %v3144_v40 = vcombine.low %v3099_v38, %v3107_v9  ;;  %v846_v23 = vshrl.u32 %v3089_v44, 16  ;;  %v849_v31 = vshll.u32 %v3089_v44, 16  ;;  %v859_v27 = vshrl.u32 %v3092_v29, 16 }
  0x61   : > { %377 = vrot.lane.b32.xlu0 %v2955_v22, %s2519_s20  ;;  %v1250_v14 = vsel %vm2827_vm6, %v1248_v55, %v1249_v45  ;;  %v654_v48 = vshrl.u32 %v3099_v38, 16  ;;  %v657_v1 = vshll.u32 %v3099_v38, 16  ;;  %v3167_v30 = vcombine.low %v3127_v7, %v3130_v10  ;;  %v3189_v45 = vld [vmem:[%s2571_s19 + $0x68] sm:$0xf] }
  0x62   : > { %3763 = vst [vmem:[#allocation9_spill] sm:$0xff] %v3144_v40  ;;  %v3159_v60 = vcombine.low %v1247_v62, %v1250_v14  ;;  %356 = vst.msk [vmem:[#allocation2 + $0x30] sm:$0xff] %vm349_vm0, %v3144_v40  ;;  %v3171_v12 = vrot.slane %v646_v53, 4  ;;  %v870_v41 = vshrl.u32 %v3127_v7, 16  ;;  %v3177_v59 = vcombine.low %v3147_v17, %v3150_v8 }
  0x63   : > { %3764 = vst [vmem:[#allocation10_spill] sm:$0xff] %v3167_v30  ;;  %v873_v20 = vshll.u32 %v3127_v7, 16  ;;  %v883_v50 = vshrl.u32 %v3130_v10, 16  ;;  %365 = vst.msk [vmem:[#allocation2 + $0x78] sm:$0xff] %vm349_vm0, %v3167_v30  ;;  %v681_v16 = vshll.u32 %v3147_v17, 16  ;;  %v848_v53 = vrot.slane %v846_v23, 4 }
  0x64   : > { %461 = vrot.lane.b32.xlu1 %v2917_v4, %s2520_s21  ;;  %v667_v4 = vshrl.u32 %v3107_v9, 16  ;;  %3765 = vst [vmem:[#allocation11_spill] sm:$0xff] %v3177_v59  ;;  %357 = vst.msk [vmem:[#allocation2 + $0x38] sm:$0xff] %vm349_vm0, %v3177_v59  ;;  %v851_v56 = vrot.slane %v849_v31, 5  ;;  %v855_v62 = vshll.u32 %v3092_v29, 16  ;;  %v861_v55 = vrot.slane %v859_v27, 4 }
  0x65   : > { %445 = vrot.lane.b32.xlu0 %v2955_v22, %s2520_s21  ;;  %v678_v22 = vshrl.u32 %v3147_v17, 16  ;;  %v865_v14 = vshll.u32 %v3180_v37, 16  ;;  %v656_v52 = vrot.slane %v654_v48, 4  ;;  %v659_v33 = vrot.slane %v657_v1, 5  ;;  %v3203_v59 = vld [vmem:[%s2571_s19 + $0xf8] sm:$0xf] }
  0x66   : > { %v663_v0 = vshll.u32 %v3107_v9, 16  ;;  %v852_v46 = vor.u32 %v851_v56, %v848_v53  ;;  %v857_v26 = vrot.slane %v855_v62, 5  ;;  %v669_v23 = vrot.slane %v667_v4, 4 }
  0x67   : > { %v673_v31 = vshll.u32 %v3189_v45, 16  ;;  %v691_v11 = vshrl.u32 %v3150_v8, 16  ;;  %v867_v27 = vrot.slane %v865_v14, 5  ;;  %v660_v28 = vor.u32 %v659_v33, %v656_v52 }
  0x68   : > { %463 = vrot.lane.b32.xlu1 %v2963_v21, %s2520_s21  ;;  %v665_v58 = vrot.slane %v663_v0, 5  ;;  %v853_v30 = vrot.slane %v852_v46, 4  ;;  %v862_v48 = vor.u32 %v861_v55, %v857_v26  ;;  %v872_v40 = vrot.slane %v870_v41, 4 }
  0x69   : > { %447 = vrot.lane.b32.xlu0 %v2980_v32, %s2520_s21  ;;  %v675_v1 = vrot.slane %v673_v31, 5  ;;  %v661_v53 = vrot.slane %v660_v28, 4  ;;  %v875_v4 = vrot.slane %v873_v20, 5  ;;  %v879_v62 = vshll.u32 %v3130_v10, 16 }
  0x6a   : > { %v670_v56 = vor.u32 %v669_v23, %v665_v58  ;;  %v858_v0 = vsel %vm2720_vm3, %v853_v30, %v857_v26  ;;  %v863_v52 = vrot.slane %v862_v48, 4  ;;  %v885_v46 = vrot.slane %v883_v50, 4  ;;  %v3218_v23 = vld [vmem:[%s2571_s19 + $0x78] sm:$0xf] }
  0x6b   : > { %v889_v33 = vshll.u32 %v3203_v59, 16  ;;  %v666_v41 = vsel %vm2720_vm3, %v661_v53, %v665_v58  ;;  %v876_v55 = vor.u32 %v875_v4, %v872_v40  ;;  %v881_v28 = vrot.slane %v879_v62, 5 }
  0x6c   : > { %961 = vrot.lane.b32.xlu1 %v2811_v61, %s2521_s22  ;;  %v671_v61 = vrot.slane %v670_v56, 4  ;;  %v868_v20 = vsel %vm2720_vm3, %v863_v52, %v867_v27  ;;  %v683_v31 = vrot.slane %v681_v16, 5  ;;  %v687_v48 = vshll.u32 %v3150_v8, 16 }
  0x6d   : > { %945 = vrot.lane.b32.xlu0 %v2818_v39, %s2521_s22  ;;  %v891_v14 = vrot.slane %v889_v33, 5  ;;  %v680_v39 = vrot.slane %v678_v22, 4  ;;  %v3222_v26 = vcombine.low %v858_v0, %v868_v20  ;;  %v877_v58 = vrot.slane %v876_v55, 4  ;;  %v2492_v33 = vld [vmem:[%s3731_s1 + $0x20] ss:$0 sps:$4 sm:$0xff]  }
  0x6e   : > { %v676_v30 = vsel %vm2720_vm3, %v671_v61, %v675_v1  ;;  %v886_v50 = vor.u32 %v885_v46, %v881_v28  ;;  %v693_v22 = vrot.slane %v691_v11, 4  ;;  %v642_v16 = vsel %vm2720_vm3, %v3111_v49, %v3077_v5  ;;  %2439 = vmatprep.subr.msk.bf16.mxu0 %vm1694_vm7, %v2492_v33  ;;  %2440 = vmatprep.subr.msk.bf16.mxu1 %vm1694_vm7, %v2492_v33 }
  0x6f   : > { %v3228_v40 = vcombine.low %v666_v41, %v676_v30  ;;  %v684_v27 = vor.u32 %v683_v31, %v680_v39  ;;  %v882_v53 = vsel %vm2720_vm3, %v877_v58, %v881_v28  ;;  %v697_v56 = vshll.u32 %v3218_v23, 16 }
  0x70   : > { %963 = vrot.lane.b32.xlu1 %v2838_v25, %s2521_s22  ;;  %v887_v1 = vrot.slane %v886_v50, 4  ;;  %v652_v4 = vsel %vm2720_vm3, %v3171_v12, %v3136_v54  ;;  %v689_v0 = vrot.slane %v687_v48, 5  ;;  %v2160_v11 = vrot.slane %v3089_v44, 9 }
  0x71   : > { %947 = vrot.lane.b32.xlu0 %v2862_v15, %s2521_s22  ;;  %v685_v62 = vrot.slane %v684_v27, 4  ;;  %v699_v49 = vrot.slane %v697_v56, 5  ;;  %v1309_v52 = vrot.slane %v3092_v29, 5  ;;  %v1312_v46 = vrot.slane %v3180_v37, 5 }
  0x72   : > { %v892_v5 = vsel %vm2720_vm3, %v887_v1, %v891_v14  ;;  %v694_v44 = vor.u32 %v693_v22, %v689_v0  ;;  %v2152_v12 = vrot.slane %v3099_v38, 9  ;;  %v1253_v37 = vrot.slane %v3107_v9, 5 }
  0x73   : > { %v3254_v54 = vcombine.low %v882_v53, %v892_v5  ;;  %v1310_v29 = vsel %vm2827_vm6, %v2160_v11, %v1309_v52  ;;  %v1311_v41 = vrot.slane %v1309_v52, 4  ;;  %v1256_v61 = vrot.slane %v3189_v45, 5 }
  0x74   : > { %1053 = vrot.lane.b32.xlu1 %v2838_v25, %s2522_s23  ;;  %v690_v25 = vsel %vm2720_vm3, %v685_v62, %v689_v0  ;;  %v695_v55 = vrot.slane %v694_v44, 4  ;;  %v1316_v28 = vrot.slane %v3130_v10, 5  ;;  %v1254_v20 = vsel %vm2827_vm6, %v2152_v12, %v1253_v37 }
  0x75   : > { %1037 = vrot.lane.b32.xlu0 %v2862_v15, %s2522_s23  ;;  %v2161_v15 = vrot.slane %v3127_v7, 9  ;;  %v1313_v38 = vsel %vm2827_vm6, %v1311_v41, %v1312_v46  ;;  %v1255_v14 = vrot.slane %v1253_v37, 4  ;;  %v1696_v9 = vsel %vm1694_vm7, %v2492_v33, 0  ;;  %v3769_v46 = vld [vmem:[#allocation10_spill] sm:$0xff]  ;;  %v3770_v33 = vld [vmem:[#allocation11_spill] sm:$0xff] }
  0x76   : > { %v700_v7 = vsel %vm2720_vm3, %v695_v55, %v699_v49  ;;  %v3275_v45 = vcombine.low %v1310_v29, %v1313_v38  ;;  %v1318_v39 = vrot.slane %v1316_v28, 4  ;;  %2396 = vmatpush3.bf16.msra.mxu0 %v1696_v9  ;;  %2438 = vmatpush3.bf16.msra.mxu1 %v1696_v9  ;;  %v1319_v58 = vrot.slane %v3203_v59, 5 }
  0x77   : > { %v1317_v10 = vsel %vm2827_vm6, %v2161_v15, %v1316_v28  ;;  %v3279_v31 = vcombine.low %v690_v25, %v700_v7  ;;  %v1257_v30 = vsel %vm2827_vm6, %v1255_v14, %v1256_v61  ;;  %v2153_v50 = vrot.slane %v3147_v17, 9 }
  0x78   : > { %1055 = vrot.lane.b32.xlu1 %v3055_v24, %s2522_s23  ;;  %v3285_v27 = vcombine.low %v1254_v20, %v1257_v30  ;;  %v1260_v48 = vrot.slane %v3150_v8, 5  ;;  %v1263_v22 = vrot.slane %v3218_v23, 5  ;;  %v3766_v53 = vsel %vm2720_vm3, %v3069_v19, %v3057_v2 }
  0x79   : > { %1039 = vrot.lane.b32.xlu0 %v3061_v43, %s2522_s23  ;;  %v3767_v59 = vsel %vm2720_vm3, %v3037_v51, %v3013_v6  ;;  %v1320_v8 = vsel %vm2827_vm6, %v1318_v39, %v1319_v58  ;;  %v3307_v23 = vcombine.low %v642_v16, %v652_v4  ;;  %vm1645_vm0 = vcmask 588800  }
  0x7a   : > { %v3301_v17 = vcombine.low %v3767_v59, %v3766_v53  ;;  %v3309_v1 = vcombine.low %v1317_v10, %v1320_v8  ;;  %v1261_v2 = vsel %vm2827_vm6, %v2153_v50, %v1260_v48  ;;  %v1262_v19 = vrot.slane %v1260_v48, 4  ;;  %v3455_v53 = vld [vmem:[%s2571_s19 + $0x104] sm:$0xf] }
  0x7c   : > { %1145 = vrot.lane.b32.xlu1 %v3055_v24, %s2523_s24  ;;  %v1264_v56 = vsel %vm2827_vm6, %v1262_v19, %v1263_v22  ;;  %v3452_v22 = vld [vmem:[%s2571_s19 + $0x100] sm:$0xf]  ;;  %v3469_v19 = vld [vmem:[%s2571_s19 + $0x110] sm:$0xf] }
  0x7d   : > { %1129 = vrot.lane.b32.xlu0 %v3061_v43, %s2523_s24  ;;  %v3317_v6 = vcombine.low %v1261_v2, %v1264_v56  ;;  %v2126_v8 = vcombine.low %v3452_v22, %v3455_v53  ;;  %v1007_v56 = vshrl.u32 %v3452_v22, 16 }
  0x80   : > { %1147 = vrot.lane.b32.xlu1 %v3301_v17, %s2523_s24 }
  0x81   : > { %1131 = vrot.lane.b32.xlu0 %v3307_v23, %s2523_s24 }
  0x84   : > { %1389 = vrot.lane.b32.xlu1 %v2950_v36, %s2524_s27 }
  0x85   : > { %1373 = vrot.lane.b32.xlu0 %v2971_v63, %s2524_s27 }
  0x88   : > { %1391 = vrot.lane.b32.xlu1 %v3030_v34, %s2524_s27 }
  0x89   : > { %1375 = vrot.lane.b32.xlu0 %v3039_v3, %s2524_s27  ;;  %v374_v51 = vpop.permute.xlu1 %373 }
  0x8a   : > { %421 = vst.msk [vmem:[#allocation2 + $0x8] sm:$0xff] %vm419_vm8, %v374_v51  ;;  %v372_v16 = vpop.permute.xlu0 %371  ;;  %v1010_v51 = vshll.u32 %v3452_v22, 16 }
  0x8b   : > { %420 = vst.msk [vmem:[#allocation2] sm:$0xff] %vm419_vm8, %v372_v16  ;;  %v1020_v16 = vshrl.u32 %v3455_v53, 16 }
  0x8c   : > { %1465 = vrot.lane.b32.xlu1 %v3030_v34, %s2525_s5 }
  0x8d   : > { %1449 = vrot.lane.b32.xlu0 %v3039_v3, %s2525_s5  ;;  %v390_v36 = vpop.permute.xlu1 %389 }
  0x8e   : > { %429 = vst.msk [vmem:[#allocation2 + $0x48] sm:$0xff] %vm419_vm8, %v390_v36  ;;  %v388_v63 = vpop.permute.xlu0 %387  ;;  %v3771_v36 = vld [vmem:[#allocation4_spill] sm:$0xff] }
  0x8f   : > { %428 = vst.msk [vmem:[#allocation2 + $0x40] sm:$0xff] %vm419_vm8, %v388_v63  ;;  %v3477_v63 = vld [vmem:[%s2571_s19 + $0x114] sm:$0xf] }
  0x90   : > { %1467 = vrot.lane.b32.xlu1 %v3094_v57, %s2525_s5 }
  0x91   : > { %1451 = vrot.lane.b32.xlu0 %v3113_v13, %s2525_s5  ;;  %v458_v4 = vpop.permute.xlu1 %457 }
  0x92   : > { %498 = vst.msk [vmem:[#allocation2 + $0x40] sm:$0xff] %vm489_vm9, %v458_v4  ;;  %v442_v34 = vpop.permute.xlu0 %441  ;;  %v1016_v4 = vshll.u32 %v3455_v53, 16 }
  0x93   : > { %490 = vst.msk [vmem:[#allocation2] sm:$0xff] %vm489_vm9, %v442_v34 }
  0x94   : > { %1541 = vrot.lane.b32.xlu1 %v3094_v57, %s2526_s8 }
  0x95   : > { %1525 = vrot.lane.b32.xlu0 %v3113_v13, %s2526_s8  ;;  %v460_v3 = vpop.permute.xlu1 %459 }
  0x96   : > { %499 = vst.msk [vmem:[#allocation2 + $0x48] sm:$0xff] %vm489_vm9, %v460_v3  ;;  %v444_v62 = vpop.permute.xlu0 %443 }
  0x97   : > { %491 = vst.msk [vmem:[#allocation2 + $0x8] sm:$0xff] %vm489_vm9, %v444_v62  ;;  %v2127_v62 = vcombine.low %v3469_v19, %v3477_v63 }
  0x98   : > { %395 = vrot.lane.b32.xlu1 %v2963_v21, %s2519_s20  ;;  %v3768_v21 = vld [vmem:[#allocation9_spill] sm:$0xff] }
  0x99   : > { %379 = vrot.lane.b32.xlu0 %v2980_v32, %s2519_s20 }
  0x9c   : > { %1543 = vrot.lane.b32.xlu1 %v3138_v42, %s2526_s8  ;;  %v958_v0 = vpop.permute.xlu1 %957 }
  0x9d   : > { %1527 = vrot.lane.b32.xlu0 %v3159_v60, %s2526_s8  ;;  %998 = vst.msk [vmem:[#allocation2 + $0x40] sm:$0xff] %vm989_vm10, %v958_v0  ;;  %v1009_v0 = vrot.slane %v1007_v56, 4 }
  0x9f   : > { %v942_v11 = vpop.permute.xlu0 %941 }
  0xa0   : > { %990 = vst.msk [vmem:[#allocation2] sm:$0xff] %vm989_vm10, %v942_v11  ;;  %397 = vrot.lane.b32.xlu1 %v3117_v35, %s2519_s20  ;;  %v1012_v11 = vrot.slane %v1010_v51, 5 }
  0xa1   : > { %381 = vrot.lane.b32.xlu0 %v3768_v21, %s2519_s20 }
  0xa2   : > { %v960_v32 = vpop.permute.xlu1 %959 }
  0xa3   : > { %999 = vst.msk [vmem:[#allocation2 + $0x48] sm:$0xff] %vm989_vm10, %v960_v32  ;;  %v944_v5 = vpop.permute.xlu0 %943  ;;  %v1022_v32 = vrot.slane %v1020_v16, 4  ;;  %v1437_v16 = vrot.slane %v3455_v53, 5 }
  0xa4   : > { %991 = vst.msk [vmem:[#allocation2 + $0x8] sm:$0xff] %vm989_vm10, %v944_v5  ;;  %465 = vrot.lane.b32.xlu1 %v3117_v35, %s2520_s21 }
  0xa5   : > { %449 = vrot.lane.b32.xlu0 %v3768_v21, %s2520_s21  ;;  %v1018_v21 = vrot.slane %v1016_v4, 5 }
  0xa6   : > { %v1050_v49 = vpop.permute.xlu1 %1049 }
  0xa7   : > { %1090 = vst.msk [vmem:[#allocation2 + $0x40] sm:$0xff] %vm1081_vm11, %v1050_v49  ;;  %v1034_v52 = vpop.permute.xlu0 %1033  ;;  %v3488_v49 = vld [vmem:[%s2571_s19 + $0x108] sm:$0xf] }
  0xa8   : > { %1082 = vst.msk [vmem:[#allocation2] sm:$0xff] %vm1081_vm11, %v1034_v52  ;;  %467 = vrot.lane.b32.xlu1 %v3769_v46, %s2520_s21 }
  0xa9   : > { %451 = vrot.lane.b32.xlu0 %v3770_v33, %s2520_s21 }
  0xaa   : > { %v1052_v25 = vpop.permute.xlu1 %1051 }
  0xab   : > { %1091 = vst.msk [vmem:[#allocation2 + $0x48] sm:$0xff] %vm1081_vm11, %v1052_v25  ;;  %v1036_v35 = vpop.permute.xlu0 %1035  ;;  %v1112_v25 = vshrl.u32 %v3477_v63, 16 }
  0xac   : > { %1083 = vst.msk [vmem:[#allocation2 + $0x8] sm:$0xff] %vm1081_vm11, %v1036_v35  ;;  %965 = vrot.lane.b32.xlu1 %v3055_v24, %s2521_s22  ;;  %v3772_v35 = vld [vmem:[#allocation3_spill] sm:$0xff] }
  0xad   : > { %949 = vrot.lane.b32.xlu0 %v3061_v43, %s2521_s22 }
  0xae   : > { %v1142_v44 = vpop.permute.xlu1 %1141 }
  0xaf   : > { %1182 = vst.msk [vmem:[#allocation2 + $0x40] sm:$0xff] %vm1173_vm12, %v1142_v44  ;;  %v1126_v12 = vpop.permute.xlu0 %1125  ;;  %v1013_v44 = vor.u32 %v1012_v11, %v1009_v0 }
  0xb0   : > { %1174 = vst.msk [vmem:[#allocation2] sm:$0xff] %vm1173_vm12, %v1126_v12  ;;  %967 = vrot.lane.b32.xlu1 %v3301_v17, %s2521_s22  ;;  %v1023_v12 = vor.u32 %v1022_v32, %v1018_v21 }
  0xb1   : > { %951 = vrot.lane.b32.xlu0 %v3307_v23, %s2521_s22 }
  0xb2   : > { %v1144_v29 = vpop.permute.xlu1 %1143 }
  0xb3   : > { %1183 = vst.msk [vmem:[#allocation2 + $0x48] sm:$0xff] %vm1173_vm12, %v1144_v29  ;;  %v1128_v24 = vpop.permute.xlu0 %1127  ;;  %v1026_v29 = vshll.u32 %v3488_v49, 16 }
  0xb4   : > { %1175 = vst.msk [vmem:[#allocation2 + $0x8] sm:$0xff] %vm1173_vm12, %v1128_v24  ;;  %1057 = vrot.lane.b32.xlu1 %v3301_v17, %s2522_s23  ;;  %v1108_v24 = vshll.u32 %v3477_v63, 16 }
  0xb5   : > { %1041 = vrot.lane.b32.xlu0 %v3307_v23, %s2522_s23 }
  0xb6   : > { %v1386_v43 = vpop.permute.xlu1 %1385 }
  0xb7   : > { %1426 = vst.msk [vmem:[#allocation2 + $0x40] sm:$0xff] %vm1417_vm13, %v1386_v43  ;;  %v1370_v41 = vpop.permute.xlu0 %1369 }
  0xb8   : > { %1418 = vst.msk [vmem:[#allocation2] sm:$0xff] %vm1417_vm13, %v1370_v41  ;;  %1059 = vrot.lane.b32.xlu1 %v3222_v26, %s2522_s23 }
  0xb9   : > { %1043 = vrot.lane.b32.xlu0 %v3228_v40, %s2522_s23 }
  0xba   : > { %v1388_v37 = vpop.permute.xlu1 %1387 }
  0xbb   : > { %1427 = vst.msk [vmem:[#allocation2 + $0x48] sm:$0xff] %vm1417_vm13, %v1388_v37  ;;  %v1372_v61 = vpop.permute.xlu0 %1371 }
  0xbc   : > { %1419 = vst.msk [vmem:[#allocation2 + $0x8] sm:$0xff] %vm1417_vm13, %v1372_v61  ;;  %1149 = vrot.lane.b32.xlu1 %v3222_v26, %s2523_s24 }
  0xbd   : > { %1133 = vrot.lane.b32.xlu0 %v3228_v40, %s2523_s24 }
  0xbe   : > { %v1462_v55 = vpop.permute.xlu1 %1461 }
  0xbf   : > { %1502 = vst.msk [vmem:[#allocation2 + $0x40] sm:$0xff] %vm1493_vm14, %v1462_v55  ;;  %v1446_v15 = vpop.permute.xlu0 %1445  ;;  %v1114_v55 = vrot.slane %v1112_v25, 4 }
  0xc0   : > { %1494 = vst.msk [vmem:[#allocation2] sm:$0xff] %vm1493_vm14, %v1446_v15  ;;  %1151 = vrot.lane.b32.xlu1 %v3254_v54, %s2523_s24  ;;  %v1014_v15 = vrot.slane %v1013_v44, 4 }
  0xc1   : > { %1135 = vrot.lane.b32.xlu0 %v3279_v31, %s2523_s24 }
  0xc2   : > { %v1464_v28 = vpop.permute.xlu1 %1463 }
  0xc3   : > { %1503 = vst.msk [vmem:[#allocation2 + $0x48] sm:$0xff] %vm1493_vm14, %v1464_v28  ;;  %v1448_v38 = vpop.permute.xlu0 %1447  ;;  %v1024_v28 = vrot.slane %v1023_v12, 4 }
  0xc4   : > { %1495 = vst.msk [vmem:[#allocation2 + $0x8] sm:$0xff] %vm1493_vm14, %v1448_v38  ;;  %1393 = vrot.lane.b32.xlu1 %v3094_v57, %s2524_s27  ;;  %v1028_v38 = vrot.slane %v1026_v29, 5 }
  0xc5   : > { %1377 = vrot.lane.b32.xlu0 %v3113_v13, %s2524_s27 }
  0xc6   : > { %v1538_v20 = vpop.permute.xlu1 %1537 }
  0xc7   : > { %1578 = vst.msk [vmem:[#allocation2 + $0x40] sm:$0xff] %vm1569_vm15, %v1538_v20  ;;  %v1522_v14 = vpop.permute.xlu0 %1521  ;;  %v1110_v20 = vrot.slane %v1108_v24, 5 }
  0xc8   : > { %1570 = vst.msk [vmem:[#allocation2] sm:$0xff] %vm1569_vm15, %v1522_v14  ;;  %1395 = vrot.lane.b32.xlu1 %v3138_v42, %s2524_s27 }
  0xc9   : > { %1379 = vrot.lane.b32.xlu0 %v3159_v60, %s2524_s27 }
  0xca   : > { %v392_v9 = vpop.permute.xlu1 %391 }
  0xcb   : > { %430 = vst.msk [vmem:[#allocation2 + $0x50] sm:$0xff] %vm419_vm8, %v392_v9  ;;  %v376_v57 = vpop.permute.xlu0 %375  ;;  %v3507_v9 = vld [vmem:[%s2571_s19 + $0x118] sm:$0xf] }
  0xcc   : > { %422 = vst.msk [vmem:[#allocation2 + $0x10] sm:$0xff] %vm419_vm8, %v376_v57  ;;  %1469 = vrot.lane.b32.xlu1 %v3138_v42, %s2525_s5 }
  0xcd   : > { %1453 = vrot.lane.b32.xlu0 %v3159_v60, %s2525_s5 }
  0xce   : > { %v1540_v13 = vpop.permute.xlu1 %1539  ;;  %v1594_v7 = vld [vmem:[#allocation2 + $0x40] sm:$0xff] }
  0xcf   : > { %1579 = vst.msk [vmem:[#allocation2 + $0x48] sm:$0xff] %vm1569_vm15, %v1540_v13  ;;  %v1524_v10 = vpop.permute.xlu0 %1523  ;;  %v1586_v39 = vld [vmem:[#allocation2] sm:$0xff]  ;;  %2413 = vmatprep.mubr.msk.bf16.mxu1 %vm1645_vm0, %v1594_v7  ;;  %v1029_v13 = vsel %vm2720_vm3, %v1024_v28, %v1028_v38  ;;  %v1115_v7 = vor.u32 %v1114_v55, %v1110_v20 }
  0xd0   : > { %1571 = vst.msk [vmem:[#allocation2 + $0x8] sm:$0xff] %vm1569_vm15, %v1524_v10  ;;  %2397 = vmatprep.mubr.msk.bf16.mxu0 %vm1645_vm0, %v1586_v39  ;;  %1471 = vrot.lane.b32.xlu1 %v3275_v45, %s2525_s5  ;;  %v1118_v10 = vshll.u32 %v3507_v9, 16 }
  0xd1   : > { %1455 = vrot.lane.b32.xlu0 %v3285_v27, %s2525_s5 }
  0xd2   : > { %v394_v42 = vpop.permute.xlu1 %393 }
  0xd3   : > { %431 = vst.msk [vmem:[#allocation2 + $0x58] sm:$0xff] %vm419_vm8, %v394_v42  ;;  %v378_v60 = vpop.permute.xlu0 %377 }
  0xd4   : > { %423 = vst.msk [vmem:[#allocation2 + $0x18] sm:$0xff] %vm419_vm8, %v378_v60  ;;  %1545 = vrot.lane.b32.xlu1 %v3275_v45, %s2526_s8 }
  0xd5   : > { %1529 = vrot.lane.b32.xlu0 %v3285_v27, %s2526_s8 }
  0xd6   : > { %v462_v30 = vpop.permute.xlu1 %461  ;;  %v1595_v58 = vld [vmem:[#allocation2 + $0x48] sm:$0xff] }
  0xd7   : > { %500 = vst.msk [vmem:[#allocation2 + $0x50] sm:$0xff] %vm489_vm9, %v462_v30  ;;  %v446_v50 = vpop.permute.xlu0 %445  ;;  %v1587_v48 = vld [vmem:[#allocation2 + $0x8] sm:$0xff]  ;;  %2414 = vmatmul.mubr.msk.bf16.vlgmr.msra.gmra.mrb[0].mxu1 %vm1645_vm0, %v1595_v58  ;;  %v1116_v58 = vrot.slane %v1115_v7, 4 }
  0xd8   : > { %492 = vst.msk [vmem:[#allocation2 + $0x10] sm:$0xff] %vm489_vm9, %v446_v50  ;;  %2398 = vmatmul.mubr.msk.bf16.vlgmr.msra.gmra.mrb[0].mxu0 %vm1645_vm0, %v1587_v48  ;;  %399 = vrot.lane.b32.xlu1 %v3769_v46, %s2519_s20  ;;  %v1099_v46 = vshrl.u32 %v3469_v19, 16  ;;  %v1120_v50 = vrot.slane %v1118_v10, 5 }
  0xd9   : > { %383 = vrot.lane.b32.xlu0 %v3770_v33, %s2519_s20  ;;  %v1102_v33 = vshll.u32 %v3469_v19, 16 }
  0xda   : > { %v464_v59 = vpop.permute.xlu1 %463  ;;  %v1101_v37 = vrot.slane %v1099_v46, 4 }
  0xdb   : > { %501 = vst.msk [vmem:[#allocation2 + $0x58] sm:$0xff] %vm489_vm9, %v464_v59  ;;  %v448_v17 = vpop.permute.xlu0 %447  ;;  %v1104_v61 = vrot.slane %v1102_v33, 5 }
  0xdc   : > { %493 = vst.msk [vmem:[#allocation2 + $0x18] sm:$0xff] %vm489_vm9, %v448_v17  ;;  %1547 = vrot.lane.b32.xlu1 %v3309_v1, %s2526_s8  ;;  %v3773_v17 = vld [vmem:[#allocation5_spill] sm:$0xff] }
  0xdd   : > { %1531 = vrot.lane.b32.xlu0 %v3317_v6, %s2526_s8 }
  0xde   : > { %v962_v23 = vpop.permute.xlu1 %961 }
  0xdf   : > { %1000 = vst.msk [vmem:[#allocation2 + $0x50] sm:$0xff] %vm989_vm10, %v962_v23  ;;  %v946_v2 = vpop.permute.xlu0 %945 }
  0xe0   : > { %992 = vst.msk [vmem:[#allocation2 + $0x10] sm:$0xff] %vm989_vm10, %v946_v2  ;;  %401 = vrot.lane.b32.xlu1 %v2126_v8, %s2519_s20 }
  0xe1   : > { %385 = vrot.lane.b32.xlu0 %v3771_v36, %s2519_s20  ;;  %s3675_s20 = scalar_lea.vmem %s3733_s3, %s2238_s17 }
  0xe2   : > { %v964_v34 = vpop.permute.xlu1 %963 }
  0xe3   : > { %1001 = vst.msk [vmem:[#allocation2 + $0x58] sm:$0xff] %vm989_vm10, %v964_v34  ;;  %v948_v3 = vpop.permute.xlu0 %947  ;;  %v2178_v34 = vrot.slane %v3452_v22, 9  ;;  %v1513_v22 = vrot.slane %v3477_v63, 5 }
  0xe4   : > { %993 = vst.msk [vmem:[#allocation2 + $0x18] sm:$0xff] %vm989_vm10, %v948_v3  ;;  %469 = vrot.lane.b32.xlu1 %v2126_v8, %s2520_s21  ;;  %v1439_v3 = vrot.slane %v1437_v16, 4 }
  0xe5   : > { %453 = vrot.lane.b32.xlu0 %v3771_v36, %s2520_s21 }
  0xe6   : > { %v1054_v5 = vpop.permute.xlu1 %1053 }
  0xe7   : > { %1092 = vst.msk [vmem:[#allocation2 + $0x50] sm:$0xff] %vm1081_vm11, %v1054_v5  ;;  %v1038_v52 = vpop.permute.xlu0 %1037  ;;  %v2180_v5 = vrot.slane %v3469_v19, 9 }
  0xe8   : > { %1084 = vst.msk [vmem:[#allocation2 + $0x10] sm:$0xff] %vm1081_vm11, %v1038_v52  ;;  %471 = vrot.lane.b32.xlu1 %v2127_v62, %s2520_s21  ;;  %v1440_v62 = vrot.slane %v3488_v49, 5  ;;  %v1515_v49 = vrot.slane %v1513_v22, 4  ;;  %v1516_v52 = vrot.slane %v3507_v9, 5 }
  0xe9   : > { %455 = vrot.lane.b32.xlu0 %v3772_v35, %s2520_s21 }
  0xea   : > { %v1056_v43 = vpop.permute.xlu1 %1055  ;;  %v1517_v19 = vsel %vm2827_vm6, %v1515_v49, %v1516_v52 }
  0xeb   : > { %1093 = vst.msk [vmem:[#allocation2 + $0x58] sm:$0xff] %vm1081_vm11, %v1056_v43  ;;  %v1040_v41 = vpop.permute.xlu0 %1039 }
  0xec   : > { %1085 = vst.msk [vmem:[#allocation2 + $0x18] sm:$0xff] %vm1081_vm11, %v1040_v41  ;;  %969 = vrot.lane.b32.xlu1 %v3222_v26, %s2521_s22  ;;  %v1105_v26 = vor.u32 %v1104_v61, %v1101_v37 }
  0xed   : > { %953 = vrot.lane.b32.xlu0 %v3228_v40, %s2521_s22  ;;  %v1019_v40 = vsel %vm2720_vm3, %v1014_v15, %v1018_v21 }
  0xee   : > { %v1146_v14 = vpop.permute.xlu1 %1145  ;;  %v2144_v60 = vcombine.low %v1019_v40, %v1029_v13  ;;  %v1106_v30 = vrot.slane %v1105_v26, 4 }
  0xef   : > { %1184 = vst.msk [vmem:[#allocation2 + $0x50] sm:$0xff] %vm1173_vm12, %v1146_v14  ;;  %v1130_v57 = vpop.permute.xlu0 %1129 }
  0xf0   : > { %1176 = vst.msk [vmem:[#allocation2 + $0x10] sm:$0xff] %vm1173_vm12, %v1130_v57  ;;  %971 = vrot.lane.b32.xlu1 %v3254_v54, %s2521_s22 }
  0xf1   : > { %955 = vrot.lane.b32.xlu0 %v3279_v31, %s2521_s22 }
  0xf2   : > { %v1148_v39 = vpop.permute.xlu1 %1147 }
  0xf3   : > { %1185 = vst.msk [vmem:[#allocation2 + $0x58] sm:$0xff] %vm1173_vm12, %v1148_v39  ;;  %v1132_v42 = vpop.permute.xlu0 %1131 }
  0xf4   : > { %1177 = vst.msk [vmem:[#allocation2 + $0x18] sm:$0xff] %vm1173_vm12, %v1132_v42  ;;  %1061 = vrot.lane.b32.xlu1 %v3254_v54, %s2522_s23  ;;  %v1111_v54 = vsel %vm2720_vm3, %v1106_v30, %v1110_v20 }
  0xf5   : > { %1045 = vrot.lane.b32.xlu0 %v3279_v31, %s2522_s23  ;;  %v1121_v31 = vsel %vm2720_vm3, %v1116_v58, %v1120_v50 }
  0xf6   : > { %v1390_v48 = vpop.permute.xlu1 %1389  ;;  %v2145_v2 = vcombine.low %v1111_v54, %v1121_v31 }
  0xf7   : > { %1428 = vst.msk [vmem:[#allocation2 + $0x50] sm:$0xff] %vm1417_vm13, %v1390_v48  ;;  %v1374_v59 = vpop.permute.xlu0 %1373 }
  0xf8   : > { %1420 = vst.msk [vmem:[#allocation2 + $0x10] sm:$0xff] %vm1417_vm13, %v1374_v59  ;;  %1063 = vrot.lane.b32.xlu1 %v2144_v60, %s2522_s23 }
  0xf9   : > { %1047 = vrot.lane.b32.xlu0 %v3773_v17, %s2522_s23 }
  0xfa   : > { %v1392_v8 = vpop.permute.xlu1 %1391 }
  0xfb   : > { %1429 = vst.msk [vmem:[#allocation2 + $0x58] sm:$0xff] %vm1417_vm13, %v1392_v8  ;;  %v1376_v23 = vpop.permute.xlu0 %1375 }
  0xfc   : > { %1421 = vst.msk [vmem:[#allocation2 + $0x18] sm:$0xff] %vm1417_vm13, %v1376_v23  ;;  %1153 = vrot.lane.b32.xlu1 %v2144_v60, %s2523_s24 }
  0xfd   : > { %1137 = vrot.lane.b32.xlu0 %v3773_v17, %s2523_s24 }
  0xfe   : > { %v1466_v56 = vpop.permute.xlu1 %1465 }
  0xff   : > { %1504 = vst.msk [vmem:[#allocation2 + $0x50] sm:$0xff] %vm1493_vm14, %v1466_v56  ;;  %v1450_v51 = vpop.permute.xlu0 %1449 }
 0x100   : > { %1496 = vst.msk [vmem:[#allocation2 + $0x10] sm:$0xff] %vm1493_vm14, %v1450_v51  ;;  %1155 = vrot.lane.b32.xlu1 %v2145_v2, %s2523_s24 }
 0x101   : > { %1139 = vrot.lane.b32.xlu0 %v3774_v18, %s2523_s24 }
 0x102   : > { %v1468_v36 = vpop.permute.xlu1 %1467 }
 0x103   : > { %1505 = vst.msk [vmem:[#allocation2 + $0x58] sm:$0xff] %vm1493_vm14, %v1468_v36  ;;  %v1452_v4 = vpop.permute.xlu0 %1451 }
 0x104   : > { %1497 = vst.msk [vmem:[#allocation2 + $0x18] sm:$0xff] %vm1493_vm14, %v1452_v4  ;;  %1397 = vrot.lane.b32.xlu1 %v3275_v45, %s2524_s27  ;;  %v1438_v45 = vsel %vm2827_vm6, %v2178_v34, %v1437_v16 }
 0x105   : > { %1381 = vrot.lane.b32.xlu0 %v3285_v27, %s2524_s27  ;;  %v1441_v27 = vsel %vm2827_vm6, %v1439_v3, %v1440_v62 }
 0x106   : > { %v1542_v0 = vpop.permute.xlu1 %1541  ;;  %v2179_v32 = vcombine.low %v1438_v45, %v1441_v27 }
 0x107   : > { %1580 = vst.msk [vmem:[#allocation2 + $0x50] sm:$0xff] %vm1569_vm15, %v1542_v0  ;;  %v1526_v53 = vpop.permute.xlu0 %1525 }
 0x108   : > { %1572 = vst.msk [vmem:[#allocation2 + $0x10] sm:$0xff] %vm1569_vm15, %v1526_v53  ;;  %1399 = vrot.lane.b32.xlu1 %v3309_v1, %s2524_s27 }
 0x109   : > { %1383 = vrot.lane.b32.xlu0 %v3317_v6, %s2524_s27 }
 0x10a   : > { %v396_v11 = vpop.permute.xlu1 %395 }
 0x10b   : > { %432 = vst.msk [vmem:[#allocation2 + $0x60] sm:$0xff] %vm419_vm8, %v396_v11  ;;  %v380_v21 = vpop.permute.xlu0 %379 }
 0x10c   : > { %424 = vst.msk [vmem:[#allocation2 + $0x20] sm:$0xff] %vm419_vm8, %v380_v21  ;;  %1473 = vrot.lane.b32.xlu1 %v3309_v1, %s2525_s5  ;;  %v3775_v1 = vld [vmem:[#allocation7_spill] sm:$0xff] }
 0x10d   : > { %1457 = vrot.lane.b32.xlu0 %v3317_v6, %s2525_s5  ;;  %v1514_v6 = vsel %vm2827_vm6, %v2180_v5, %v1513_v22 }
 0x10e   : > { %v1544_v46 = vpop.permute.xlu1 %1543  ;;  %v1596_v63 = vld [vmem:[#allocation2 + $0x50] sm:$0xff]  ;;  %v2181_v12 = vcombine.low %v1514_v6, %v1517_v19 }
 0x10f   : > { %1581 = vst.msk [vmem:[#allocation2 + $0x58] sm:$0xff] %vm1569_vm15, %v1544_v46  ;;  %v1528_v33 = vpop.permute.xlu0 %1527  ;;  %v1588_v25 = vld [vmem:[#allocation2 + $0x10] sm:$0xff]  ;;  %2417 = vmatprep.mubr.msk.bf16.mxu1 %vm1645_vm0, %v1596_v63 }
 0x110   : > { %1573 = vst.msk [vmem:[#allocation2 + $0x18] sm:$0xff] %vm1569_vm15, %v1528_v33  ;;  %2401 = vmatprep.mubr.msk.bf16.mxu0 %vm1645_vm0, %v1588_v25  ;;  %1475 = vrot.lane.b32.xlu1 %v2179_v32, %s2525_s5 }
 0x111   : > { %1459 = vrot.lane.b32.xlu0 %v3775_v1, %s2525_s5 }
 0x112   : > { %v398_v35 = vpop.permute.xlu1 %397 }
 0x113   : > { %433 = vst.msk [vmem:[#allocation2 + $0x68] sm:$0xff] %vm419_vm8, %v398_v35  ;;  %v382_v44 = vpop.permute.xlu0 %381 }
 0x114   : > { %425 = vst.msk [vmem:[#allocation2 + $0x28] sm:$0xff] %vm419_vm8, %v382_v44  ;;  %1549 = vrot.lane.b32.xlu1 %v2179_v32, %s2526_s8 }
 0x115   : > { %1533 = vrot.lane.b32.xlu0 %v3775_v1, %s2526_s8 }
 0x116   : > { %v466_v29 = vpop.permute.xlu1 %465  ;;  %v1597_v24 = vld [vmem:[#allocation2 + $0x58] sm:$0xff] }
 0x117   : > { %502 = vst.msk [vmem:[#allocation2 + $0x60] sm:$0xff] %vm489_vm9, %v466_v29  ;;  %v450_v43 = vpop.permute.xlu0 %449  ;;  %v1589_v41 = vld [vmem:[#allocation2 + $0x18] sm:$0xff]  ;;  %2418 = vmatmul.mubr.msk.bf16.gmra.mrb[4].mxu1 %vm1645_vm0, %v1597_v24 }
 0x118   : > { %494 = vst.msk [vmem:[#allocation2 + $0x20] sm:$0xff] %vm489_vm9, %v450_v43  ;;  %2402 = vmatmul.mubr.msk.bf16.gmra.mrb[4].mxu0 %vm1645_vm0, %v1589_v41  ;;  %1551 = vrot.lane.b32.xlu1 %v2181_v12, %s2526_s8 }
 0x119   : > { %1535 = vrot.lane.b32.xlu0 %v3776_v47, %s2526_s8 }
 0x11a   : > { %v468_v37 = vpop.permute.xlu1 %467 }
 0x11b   : > { %503 = vst.msk [vmem:[#allocation2 + $0x68] sm:$0xff] %vm489_vm9, %v468_v37  ;;  %v452_v61 = vpop.permute.xlu0 %451 }
 0x11c   : > { %495 = vst.msk [vmem:[#allocation2 + $0x28] sm:$0xff] %vm489_vm9, %v452_v61 }
 0x11e   : > { %v966_v55 = vpop.permute.xlu1 %965 }
 0x11f   : > { %1002 = vst.msk [vmem:[#allocation2 + $0x60] sm:$0xff] %vm989_vm10, %v966_v55  ;;  %v950_v15 = vpop.permute.xlu0 %949  ;;  %v3665_v55 = vld [vmem:[%s3732_s2] ss:$0 sm:$0xff] }
 0x120   : > { %994 = vst.msk [vmem:[#allocation2 + $0x20] sm:$0xff] %vm989_vm10, %v950_v15 }
 0x122   : > { %v968_v28 = vpop.permute.xlu1 %967 }
 0x123   : > { %1003 = vst.msk [vmem:[#allocation2 + $0x68] sm:$0xff] %vm989_vm10, %v968_v28  ;;  %v952_v38 = vpop.permute.xlu0 %951 }
 0x124   : > { %995 = vst.msk [vmem:[#allocation2 + $0x28] sm:$0xff] %vm989_vm10, %v952_v38 }
 0x126   : > { %v1058_v20 = vpop.permute.xlu1 %1057 }
 0x127   : > { %1094 = vst.msk [vmem:[#allocation2 + $0x60] sm:$0xff] %vm1081_vm11, %v1058_v20  ;;  %v1042_v14 = vpop.permute.xlu0 %1041 }
 0x128   : > { %1086 = vst.msk [vmem:[#allocation2 + $0x20] sm:$0xff] %vm1081_vm11, %v1042_v14 }
 0x12a   : > { %v1060_v9 = vpop.permute.xlu1 %1059 }
 0x12b   : > { %1095 = vst.msk [vmem:[#allocation2 + $0x68] sm:$0xff] %vm1081_vm11, %v1060_v9  ;;  %v1044_v57 = vpop.permute.xlu0 %1043 }
 0x12c   : > { %1087 = vst.msk [vmem:[#allocation2 + $0x28] sm:$0xff] %vm1081_vm11, %v1044_v57 }
 0x12e   : > { %v1150_v26 = vpop.permute.xlu1 %1149 }
 0x12f   : > { %1186 = vst.msk [vmem:[#allocation2 + $0x60] sm:$0xff] %vm1173_vm12, %v1150_v26  ;;  %v1134_v40 = vpop.permute.xlu0 %1133 }
 0x130   : > { %1178 = vst.msk [vmem:[#allocation2 + $0x20] sm:$0xff] %vm1173_vm12, %v1134_v40 }
 0x132   : > { %v1152_v13 = vpop.permute.xlu1 %1151 }
 0x133   : > { %1187 = vst.msk [vmem:[#allocation2 + $0x68] sm:$0xff] %vm1173_vm12, %v1152_v13  ;;  %v1136_v7 = vpop.permute.xlu0 %1135 }
 0x134   : > { %1179 = vst.msk [vmem:[#allocation2 + $0x28] sm:$0xff] %vm1173_vm12, %v1136_v7 }
 0x136   : > { %v1394_v10 = vpop.permute.xlu1 %1393 }
 0x137   : > { %1430 = vst.msk [vmem:[#allocation2 + $0x60] sm:$0xff] %vm1417_vm13, %v1394_v10  ;;  %v1378_v39 = vpop.permute.xlu0 %1377 }
 0x138   : > { %1422 = vst.msk [vmem:[#allocation2 + $0x20] sm:$0xff] %vm1417_vm13, %v1378_v39 }
 0x13a   : > { %v1396_v42 = vpop.permute.xlu1 %1395 }
 0x13b   : > { %1431 = vst.msk [vmem:[#allocation2 + $0x68] sm:$0xff] %vm1417_vm13, %v1396_v42  ;;  %v1380_v60 = vpop.permute.xlu0 %1379 }
 0x13c   : > { %1423 = vst.msk [vmem:[#allocation2 + $0x28] sm:$0xff] %vm1417_vm13, %v1380_v60 }
 0x13e   : > { %v1470_v30 = vpop.permute.xlu1 %1469 }
 0x13f   : > { %1506 = vst.msk [vmem:[#allocation2 + $0x60] sm:$0xff] %vm1493_vm14, %v1470_v30  ;;  %v1454_v58 = vpop.permute.xlu0 %1453 }
 0x140   : > { %1498 = vst.msk [vmem:[#allocation2 + $0x20] sm:$0xff] %vm1493_vm14, %v1454_v58 }
 0x142   : > { %v1472_v50 = vpop.permute.xlu1 %1471 }
 0x143   : > { %1507 = vst.msk [vmem:[#allocation2 + $0x68] sm:$0xff] %vm1493_vm14, %v1472_v50  ;;  %v1456_v48 = vpop.permute.xlu0 %1455 }
 0x144   : > { %1499 = vst.msk [vmem:[#allocation2 + $0x28] sm:$0xff] %vm1493_vm14, %v1456_v48 }
 0x146   : > { %v1546_v59 = vpop.permute.xlu1 %1545 }
 0x147   : > { %1582 = vst.msk [vmem:[#allocation2 + $0x60] sm:$0xff] %vm1569_vm15, %v1546_v59  ;;  %v1530_v17 = vpop.permute.xlu0 %1529 }
 0x148   : > { %1574 = vst.msk [vmem:[#allocation2 + $0x20] sm:$0xff] %vm1569_vm15, %v1530_v17 }
 0x14a   : > { %v400_v54 = vpop.permute.xlu1 %399 }
 0x14b   : > { %434 = vst.msk [vmem:[#allocation2 + $0x70] sm:$0xff] %vm419_vm8, %v400_v54  ;;  %v384_v31 = vpop.permute.xlu0 %383 }
 0x14c   : > { %426 = vst.msk [vmem:[#allocation2 + $0x30] sm:$0xff] %vm419_vm8, %v384_v31 }
 0x14e   : > { %v1548_v8 = vpop.permute.xlu1 %1547  ;;  %v1598_v23 = vld [vmem:[#allocation2 + $0x60] sm:$0xff] }
 0x14f   : > { %1583 = vst.msk [vmem:[#allocation2 + $0x68] sm:$0xff] %vm1569_vm15, %v1548_v8  ;;  %v1532_v2 = vpop.permute.xlu0 %1531  ;;  %v1590_v56 = vld [vmem:[#allocation2 + $0x20] sm:$0xff]  ;;  %2421 = vmatprep.mubr.msk.bf16.mxu1 %vm1645_vm0, %v1598_v23 }
 0x150   : > { %1575 = vst.msk [vmem:[#allocation2 + $0x28] sm:$0xff] %vm1569_vm15, %v1532_v2  ;;  %2405 = vmatprep.mubr.msk.bf16.mxu0 %vm1645_vm0, %v1590_v56 }
 0x152   : > { %v402_v51 = vpop.permute.xlu1 %401 }
 0x153   : > { %435 = vst.msk [vmem:[#allocation2 + $0x78] sm:$0xff] %vm419_vm8, %v402_v51  ;;  %v386_v18 = vpop.permute.xlu0 %385 }
 0x154   : > { %427 = vst.msk [vmem:[#allocation2 + $0x38] sm:$0xff] %vm419_vm8, %v386_v18 }
 0x156   : > { %v470_v16 = vpop.permute.xlu1 %469  ;;  %v1599_v36 = vld [vmem:[#allocation2 + $0x68] sm:$0xff] }
 0x157   : > { %504 = vst.msk [vmem:[#allocation2 + $0x70] sm:$0xff] %vm489_vm9, %v470_v16  ;;  %v454_v4 = vpop.permute.xlu0 %453  ;;  %v1591_v34 = vld [vmem:[#allocation2 + $0x28] sm:$0xff]  ;;  %2422 = vmatmul.mubr.msk.bf16.gmra.mrb[8].mxu1 %vm1645_vm0, %v1599_v36 }
 0x158   : > { %496 = vst.msk [vmem:[#allocation2 + $0x30] sm:$0xff] %vm489_vm9, %v454_v4  ;;  %2406 = vmatmul.mubr.msk.bf16.gmra.mrb[8].mxu0 %vm1645_vm0, %v1591_v34 }
 0x15a   : > { %v472_v3 = vpop.permute.xlu1 %471 }
 0x15b   : > { %505 = vst.msk [vmem:[#allocation2 + $0x78] sm:$0xff] %vm489_vm9, %v472_v3  ;;  %v456_v62 = vpop.permute.xlu0 %455 }
 0x15c   : > { %497 = vst.msk [vmem:[#allocation2 + $0x38] sm:$0xff] %vm489_vm9, %v456_v62 }
 0x15e   : > { %v970_v0 = vpop.permute.xlu1 %969 }
 0x15f   : > { %1004 = vst.msk [vmem:[#allocation2 + $0x70] sm:$0xff] %vm989_vm10, %v970_v0  ;;  %v954_v53 = vpop.permute.xlu0 %953 }
 0x160   : > { %996 = vst.msk [vmem:[#allocation2 + $0x30] sm:$0xff] %vm989_vm10, %v954_v53 }
 0x162   : > { %v972_v45 = vpop.permute.xlu1 %971 }
 0x163   : > { %1005 = vst.msk [vmem:[#allocation2 + $0x78] sm:$0xff] %vm989_vm10, %v972_v45  ;;  %v956_v27 = vpop.permute.xlu0 %955 }
 0x164   : > { %997 = vst.msk [vmem:[#allocation2 + $0x38] sm:$0xff] %vm989_vm10, %v956_v27 }
 0x166   : > { %v1062_v22 = vpop.permute.xlu1 %1061 }
 0x167   : > { %1096 = vst.msk [vmem:[#allocation2 + $0x70] sm:$0xff] %vm1081_vm11, %v1062_v22  ;;  %v1046_v11 = vpop.permute.xlu0 %1045 }
 0x168   : > { %1088 = vst.msk [vmem:[#allocation2 + $0x30] sm:$0xff] %vm1081_vm11, %v1046_v11 }
 0x16a   : > { %v1064_v21 = vpop.permute.xlu1 %1063 }
 0x16b   : > { %1097 = vst.msk [vmem:[#allocation2 + $0x78] sm:$0xff] %vm1081_vm11, %v1064_v21  ;;  %v1048_v32 = vpop.permute.xlu0 %1047 }
 0x16c   : > { %1089 = vst.msk [vmem:[#allocation2 + $0x38] sm:$0xff] %vm1081_vm11, %v1048_v32 }
 0x16e   : > { %v1154_v5 = vpop.permute.xlu1 %1153 }
 0x16f   : > { %1188 = vst.msk [vmem:[#allocation2 + $0x70] sm:$0xff] %vm1173_vm12, %v1154_v5  ;;  %v1138_v49 = vpop.permute.xlu0 %1137 }
 0x170   : > { %1180 = vst.msk [vmem:[#allocation2 + $0x30] sm:$0xff] %vm1173_vm12, %v1138_v49 }
 0x172   : > { %v1156_v52 = vpop.permute.xlu1 %1155 }
 0x173   : > { %1189 = vst.msk [vmem:[#allocation2 + $0x78] sm:$0xff] %vm1173_vm12, %v1156_v52  ;;  %v1140_v46 = vpop.permute.xlu0 %1139 }
 0x174   : > { %1181 = vst.msk [vmem:[#allocation2 + $0x38] sm:$0xff] %vm1173_vm12, %v1140_v46 }
 0x176   : > { %v1398_v63 = vpop.permute.xlu1 %1397 }
 0x177   : > { %1432 = vst.msk [vmem:[#allocation2 + $0x70] sm:$0xff] %vm1417_vm13, %v1398_v63  ;;  %v1382_v33 = vpop.permute.xlu0 %1381 }
 0x178   : > { %1424 = vst.msk [vmem:[#allocation2 + $0x30] sm:$0xff] %vm1417_vm13, %v1382_v33 }
 0x17a   : > { %v1400_v25 = vpop.permute.xlu1 %1399 }
 0x17b   : > { %1433 = vst.msk [vmem:[#allocation2 + $0x78] sm:$0xff] %vm1417_vm13, %v1400_v25  ;;  %v1384_v1 = vpop.permute.xlu0 %1383 }
 0x17c   : > { %1425 = vst.msk [vmem:[#allocation2 + $0x38] sm:$0xff] %vm1417_vm13, %v1384_v1 }
 0x17e   : > { %v1474_v6 = vpop.permute.xlu1 %1473 }
 0x17f   : > { %1508 = vst.msk [vmem:[#allocation2 + $0x70] sm:$0xff] %vm1493_vm14, %v1474_v6  ;;  %v1458_v19 = vpop.permute.xlu0 %1457 }
 0x180   : > { %1500 = vst.msk [vmem:[#allocation2 + $0x30] sm:$0xff] %vm1493_vm14, %v1458_v19 }
 0x182   : > { %v1476_v35 = vpop.permute.xlu1 %1475 }
 0x183   : > { %1509 = vst.msk [vmem:[#allocation2 + $0x78] sm:$0xff] %vm1493_vm14, %v1476_v35  ;;  %v1460_v44 = vpop.permute.xlu0 %1459 }
 0x184   : > { %1501 = vst.msk [vmem:[#allocation2 + $0x38] sm:$0xff] %vm1493_vm14, %v1460_v44 }
 0x186   : > { %v1550_v12 = vpop.permute.xlu1 %1549 }
 0x187   : > { %1584 = vst.msk [vmem:[#allocation2 + $0x70] sm:$0xff] %vm1569_vm15, %v1550_v12  ;;  %v1534_v29 = vpop.permute.xlu0 %1533 }
 0x188   : > { %1576 = vst.msk [vmem:[#allocation2 + $0x30] sm:$0xff] %vm1569_vm15, %v1534_v29 }
 0x18a   : > { %v1552_v24 = vpop.permute.xlu1 %1551 }
 0x18b   : > { %1585 = vst.msk [vmem:[#allocation2 + $0x78] sm:$0xff] %vm1569_vm15, %v1552_v24  ;;  %v1536_v43 = vpop.permute.xlu0 %1535 }
 0x18c   : > { %1577 = vst.msk [vmem:[#allocation2 + $0x38] sm:$0xff] %vm1569_vm15, %v1536_v43 }
 0x18e   : > { %v1600_v41 = vld [vmem:[#allocation2 + $0x70] sm:$0xff] }
 0x18f   : > { %v1592_v47 = vld [vmem:[#allocation2 + $0x30] sm:$0xff]  ;;  %2425 = vmatprep.mubr.msk.bf16.mxu1 %vm1645_vm0, %v1600_v41 }
 0x190   : > { %2409 = vmatprep.mubr.msk.bf16.mxu0 %vm1645_vm0, %v1592_v47 }
 0x192   : > { %v1601_v37 = vld [vmem:[#allocation2 + $0x78] sm:$0xff] }
 0x193   : > { %v1593_v61 = vld [vmem:[#allocation2 + $0x38] sm:$0xff]  ;;  %2426 = vmatmul.mubr.msk.bf16.gmra.mrb[12].mxu1 %vm1645_vm0, %v1601_v37 }
 0x194   : > { %2410 = vmatmul.mubr.msk.bf16.gmra.mrb[12].mxu0 %vm1645_vm0, %v1593_v61 }
 0x1aa   : > { %v2415_v15 = vpop.f32.mrb[0].mxu1 }
 0x1ab   : > { %v2399_v28 = vpop.f32.mrb[0].mxu0  ;;  %v1796_v38 = vpop.f32.mrb[1].mxu1  ;;  %v1805_v9 = vadd.f32 %v2415_v15, %v3665_v55 }
 0x1ac   : > { %v1732_v20 = vpop.f32.mrb[1].mxu0  ;;  %v2416_v14 = vpop.f32.mrb[2].mxu1  ;;  %v1741_v13 = vadd.f32 %v2399_v28, %v3665_v55  ;;  %v1797_v7 = vadd.f32 %v3665_v55, %v1796_v38 }
 0x1ad   : > { %v2400_v57 = vpop.f32.mrb[2].mxu0  ;;  %v1808_v26 = vadd.f32 %v2416_v14, %v3665_v55  ;;  %v1799_v40 = vpop.f32.mrb[3].mxu1  ;;  %v1733_v60 = vadd.f32 %v3665_v55, %v1732_v20 }
 0x1ae   : > { %v1744_v10 = vadd.f32 %v2400_v57, %v3665_v55  ;;  %v1735_v39 = vpop.f32.mrb[3].mxu0  ;;  %v1800_v42 = vadd.f32 %v3665_v55, %v1799_v40 }
 0x1af   : > { %v2319_v30 = vpack.c.bf16 %v1808_v26, %v1805_v9  ;;  %v1736_v58 = vadd.f32 %v3665_v55, %v1735_v39 }
 0x1b0   : > { %v2279_v50 = vpack.c.bf16 %v1744_v10, %v1741_v13  ;;  %v2314_v48 = vpack.c.bf16 %v1800_v42, %v1797_v7 }
 0x1b1   : > { %2359 = vst [vmem:[%s3675_s20 + $0x48] sm:$0xff] %v2319_v30   ;;  %v2274_v59 = vpack.c.bf16 %v1736_v58, %v1733_v60 }
 0x1b2   : > { %2351 = vst [vmem:[%s3675_s20 + $0x8] sm:$0xff] %v2279_v50   ;;  %2358 = vst [vmem:[%s3675_s20 + $0x40] sm:$0xff] %v2314_v48  }
 0x1b3   : > { %2275 = vst [vmem:[%s3675_s20] sm:$0xff] %v2274_v59  }
 0x1ea   : > { %v2419_v17 = vpop.f32.mrb[4].mxu1 }
 0x1eb   : > { %v2403_v54 = vpop.f32.mrb[4].mxu0  ;;  %v1812_v31 = vpop.f32.mrb[5].mxu1  ;;  %v1821_v2 = vadd.f32 %v2419_v17, %v3665_v55 }
 0x1ec   : > { %v1748_v8 = vpop.f32.mrb[5].mxu0  ;;  %v2420_v23 = vpop.f32.mrb[6].mxu1  ;;  %v1757_v16 = vadd.f32 %v2403_v54, %v3665_v55  ;;  %v1813_v36 = vadd.f32 %v3665_v55, %v1812_v31 }
 0x1ed   : > { %v2404_v56 = vpop.f32.mrb[6].mxu0  ;;  %v1824_v51 = vadd.f32 %v2420_v23, %v3665_v55  ;;  %v1815_v18 = vpop.f32.mrb[7].mxu1  ;;  %v1749_v62 = vadd.f32 %v3665_v55, %v1748_v8 }
 0x1ee   : > { %v1760_v4 = vadd.f32 %v2404_v56, %v3665_v55  ;;  %v1751_v34 = vpop.f32.mrb[7].mxu0  ;;  %v1816_v3 = vadd.f32 %v3665_v55, %v1815_v18 }
 0x1ef   : > { %v2329_v0 = vpack.c.bf16 %v1824_v51, %v1821_v2  ;;  %v1752_v53 = vadd.f32 %v3665_v55, %v1751_v34 }
 0x1f0   : > { %v2289_v45 = vpack.c.bf16 %v1760_v4, %v1757_v16  ;;  %v2324_v27 = vpack.c.bf16 %v1816_v3, %v1813_v36 }
 0x1f1   : > { %2361 = vst [vmem:[%s3675_s20 + $0x58] sm:$0xff] %v2329_v0   ;;  %v2284_v22 = vpack.c.bf16 %v1752_v53, %v1749_v62 }
 0x1f2   : > { %2353 = vst [vmem:[%s3675_s20 + $0x18] sm:$0xff] %v2289_v45   ;;  %2360 = vst [vmem:[%s3675_s20 + $0x50] sm:$0xff] %v2324_v27  }
 0x1f3   : > { %2352 = vst [vmem:[%s3675_s20 + $0x10] sm:$0xff] %v2284_v22  }
 0x22a   : > { %v2423_v11 = vpop.f32.mrb[8].mxu1 }
 0x22b   : > { %v2407_v21 = vpop.f32.mrb[8].mxu0  ;;  %v1828_v32 = vpop.f32.mrb[9].mxu1  ;;  %v1837_v52 = vadd.f32 %v2423_v11, %v3665_v55 }
 0x22c   : > { %v1764_v5 = vpop.f32.mrb[9].mxu0  ;;  %v2424_v49 = vpop.f32.mrb[10].mxu1  ;;  %v1773_v25 = vadd.f32 %v2407_v21, %v3665_v55  ;;  %v1829_v1 = vadd.f32 %v3665_v55, %v1828_v32 }
 0x22d   : > { %v2408_v46 = vpop.f32.mrb[10].mxu0  ;;  %v1840_v63 = vadd.f32 %v2424_v49, %v3665_v55  ;;  %v1831_v33 = vpop.f32.mrb[11].mxu1  ;;  %v1765_v44 = vadd.f32 %v3665_v55, %v1764_v5 }
 0x22e   : > { %v1776_v6 = vadd.f32 %v2408_v46, %v3665_v55  ;;  %v1767_v19 = vpop.f32.mrb[11].mxu0  ;;  %v1832_v35 = vadd.f32 %v3665_v55, %v1831_v33 }
 0x22f   : > { %v2339_v12 = vpack.c.bf16 %v1840_v63, %v1837_v52  ;;  %v1768_v29 = vadd.f32 %v3665_v55, %v1767_v19 }
 0x230   : > { %v2299_v24 = vpack.c.bf16 %v1776_v6, %v1773_v25  ;;  %v2334_v43 = vpack.c.bf16 %v1832_v35, %v1829_v1 }
 0x231   : > { %2363 = vst [vmem:[%s3675_s20 + $0x68] sm:$0xff] %v2339_v12   ;;  %v2294_v41 = vpack.c.bf16 %v1768_v29, %v1765_v44 }
 0x232   : > { %2355 = vst [vmem:[%s3675_s20 + $0x28] sm:$0xff] %v2299_v24   ;;  %2362 = vst [vmem:[%s3675_s20 + $0x60] sm:$0xff] %v2334_v43  }
 0x233   : > { %2354 = vst [vmem:[%s3675_s20 + $0x20] sm:$0xff] %v2294_v41  }
 0x266   : > { %v2427_v47 = vpop.f32.mrb[12].mxu1 }
 0x267   : > { %v2411_v37 = vpop.f32.mrb[12].mxu0  ;;  %v1844_v61 = vpop.f32.mrb[13].mxu1  ;;  %v1853_v38 = vadd.f32 %v2427_v47, %v3665_v55 }
 0x268   : > { %v1780_v15 = vpop.f32.mrb[13].mxu0  ;;  %v2428_v28 = vpop.f32.mrb[14].mxu1  ;;  %v1789_v57 = vadd.f32 %v2411_v37, %v3665_v55  ;;  %v1845_v26 = vadd.f32 %v3665_v55, %v1844_v61 }
 0x269   : > { %v2412_v20 = vpop.f32.mrb[14].mxu0  ;;  %v1856_v14 = vadd.f32 %v2428_v28, %v3665_v55  ;;  %v1847_v9 = vpop.f32.mrb[15].mxu1  ;;  %v1781_v10 = vadd.f32 %v3665_v55, %v1780_v15 }
 0x26a   : > { %v1792_v40 = vadd.f32 %v2412_v20, %v3665_v55  ;;  %v1783_v13 = vpop.f32.mrb[15].mxu0  ;;  %v1848_v7 = vadd.f32 %v3665_v55, %v1847_v9 }
 0x26b   : > { %v2349_v39 = vpack.c.bf16 %v1856_v14, %v1853_v38  ;;  %v1784_v42 = vadd.f32 %v3665_v55, %v1783_v13 }
 0x26c   : > { %v2309_v60 = vpack.c.bf16 %v1792_v40, %v1789_v57  ;;  %v2344_v30 = vpack.c.bf16 %v1848_v7, %v1845_v26 }
 0x26d   : > { %2365 = vst [vmem:[%s3675_s20 + $0x78] sm:$0xff] %v2349_v39   ;;  %v2304_v58 = vpack.c.bf16 %v1784_v42, %v1781_v10 }
 0x26e   : > { %2357 = vst [vmem:[%s3675_s20 + $0x38] sm:$0xff] %v2309_v60   ;;  %2364 = vst [vmem:[%s3675_s20 + $0x70] sm:$0xff] %v2344_v30  }
 0x26f   : > { %2356 = vst [vmem:[%s3675_s20 + $0x30] sm:$0xff] %v2304_v58  }
 0x270 PF: > { %s13_s14 = sadd.s32 1, %s2517_s14   ;;  %s3777_s12 = smov %s2513_s13 }
 0x271   : > { %p10_p5 = scmp.ge.s32.totalorder %s13_s14, 4   ;;  %s3778_s13 = smov %s3780_s15 }
 0x273   :  { %12 = sbr.rel (!%p10_p5) target bundleno = 2 (0x2), region = 63 }

</bundles_post_ra>
